<compile_context>
chip_gen: v7x
topology: tpu7x:2x2x1
jax: 0.10.0
libtpu: 0.0.40
codegen_flags: <defaults>
</compile_context>

<pallas_src>
import math
from functools import partial

import jax
import jax.numpy as jnp
from jax.experimental import pallas as pl
from jax.experimental.pallas import tpu as pltpu


# ----------------------------------------------------------------------------
# helpers used inside the kernel
# ----------------------------------------------------------------------------
def _layernorm(x, gamma, beta, eps=1e-6):          # module uses eps=1e-06 everywhere
    mu = jnp.mean(x, axis=-1, keepdims=True)
    var = jnp.mean((x - mu) ** 2, axis=-1, keepdims=True)
    return (x - mu) * jax.lax.rsqrt(var + eps) * gamma + beta


# ----------------------------------------------------------------------------
# fully fused encoder kernel (whole batch in one invocation, no grid)
# ----------------------------------------------------------------------------
def net_fused_kernel(src_ref, pe_ref, w_in_ref, b_in_ref,
                     g1_ref, be1_ref, wqkv_ref, bqkv_ref, wo_ref, bo_ref,
                     g2_ref, be2_ref, w1_ref, b1_ref, w2_ref, b2_ref,
                     lnf_g_ref, lnf_b_ref, w_out_ref, b_out_ref,
                     o_ref, *, num_layers, heads, batch, softmax):
    S = src_ref.shape[0]
    B = batch
    D = w_in_ref.shape[1]
    dh = D // heads
    rows = B * S

    # ---- (S, B, In) -> batch-major rows (B*S, In) via B static slices ----
    x = src_ref[...]                                                     # (S, B, In)
    x_bm = jnp.concatenate([x[:, b, :] for b in range(B)], axis=0)       # (B*S, In)

    # ---- linear_in (sqrt(d_model) pre-folded into w_in/b_in) + PE ----
    h = jnp.dot(x_bm, w_in_ref[...],
                preferred_element_type=jnp.float32) + b_in_ref[...]      # (B*S, D)
    pe = pe_ref[...]                                                     # (S, D)
    h = h + jnp.concatenate([pe] * B, axis=0)                            # broadcast over batch
    # TODO(synk): dropout (p=0.1) after PE / attention / FFN is stochastic;
    # implemented as identity (eval-mode semantics).

    for l in range(num_layers):                                          # static unroll
        # ---- pre-LN multi-head self-attention, fused QKV projection ----
        ln1 = _layernorm(h, g1_ref[l], be1_ref[l])                       # (B*S, D)
        qkv = jnp.dot(ln1, wqkv_ref[l],
                      preferred_element_type=jnp.float32) + bqkv_ref[l]  # (B*S, 3D)
        ctx_heads = []
        for hh in range(heads):                                          # static, H small
            q = qkv[:,          hh * dh:          (hh + 1) * dh].reshape(B, S, dh)
            k = qkv[:,     D +  hh * dh:     D +  (hh + 1) * dh].reshape(B, S, dh)
            v = qkv[:, 2 * D +  hh * dh: 2 * D +  (hh + 1) * dh].reshape(B, S, dh)
            # q already scaled by 1/sqrt(dh) (folded into wqkv/bqkv)
            s = jnp.einsum('bqd,bkd->bqk', q, k,
                           preferred_element_type=jnp.float32)           # (B, S, S)
            s = s - jnp.max(s, axis=-1, keepdims=True)
            p = jnp.exp(s)
            p = p / jnp.sum(p, axis=-1, keepdims=True)
            ctx_heads.append(jnp.einsum('bqk,bkd->bqd', p, v,
                                        preferred_element_type=jnp.float32))
        # merge heads along lanes, then one dense output projection
        ctx = jnp.concatenate(ctx_heads, axis=-1).reshape(rows, D)       # (B*S, D)
        attn = jnp.dot(ctx, wo_ref[l],
                       preferred_element_type=jnp.float32) + bo_ref[l]
        h = attn + h                                                     # residual

        # ---- pre-LN position-wise feed forward (internal residual) ----
        ln2 = _layernorm(h, g2_ref[l], be2_ref[l])
        h1 = jnp.maximum(
            jnp.dot(ln2, w1_ref[l], preferred_element_type=jnp.float32) + b1_ref[l],
            0.0)
        h = jnp.dot(h1, w2_ref[l], preferred_element_type=jnp.float32) + b2_ref[l] + h

    # ---- final LayerNorm + linear_out on ALL rows (subsample in wrapper) ----
    lnf = _layernorm(h, lnf_g_ref[...], lnf_b_ref[...])
    logits = jnp.dot(lnf, w_out_ref[...],
                     preferred_element_type=jnp.float32) + b_out_ref[...]  # (B*S, O)

    if softmax:
        # F.log_softmax legacy default dim=0 on the (batch, seq, out) tensor
        # -> normalizes over the batch axis.
        O = logits.shape[-1]
        lg = logits.reshape(B, S, O)
        z = lg - jnp.max(lg, axis=0, keepdims=True)
        lg = z - jnp.log(jnp.sum(jnp.exp(z), axis=0, keepdims=True))
        logits = lg.reshape(rows, O)

    o_ref[...] = logits


# ----------------------------------------------------------------------------
# full Net forward
# ----------------------------------------------------------------------------
@partial(jax.jit, static_argnames=("heads", "softmax", "frame_offset"))
def net_forward(src, params, *, heads, softmax=True, frame_offset=0):
    S, B, In = src.shape
    Lp = params["layers"]
    L = Lp["wo"].shape[0]
    O = params["w_out"].shape[1]
    n_keep = len(range(0, S, 3)) - frame_offset
    if n_keep <= 0:
        raise ValueError("frame_offset leaves no sequence positions")

    weights = (params["pe"][:S], params["w_in"], params["b_in"],
               Lp["g1"], Lp["be1"], Lp["wqkv"], Lp["bqkv"], Lp["wo"], Lp["bo"],
               Lp["g2"], Lp["be2"], Lp["w1"], Lp["b1"], Lp["w2"], Lp["b2"],
               params["lnf_g"], params["lnf_b"], params["w_out"], params["b_out"])
    vmem = pl.BlockSpec(memory_space=pltpu.MemorySpace.VMEM)

    # TODO(synk): at real OpenNMT sizes (d_model=512, d_ff=2048, L>=6) the
    # stacked f32 weights exceed scoped VMEM; add a layer grid axis with
    # per-layer BlockSpecs (or pltpu.emit_pipeline) and bf16 weights.
    enc = pl.pallas_call(
        partial(net_fused_kernel, num_layers=L, heads=heads, batch=B,
                softmax=softmax),
        out_shape=jax.ShapeDtypeStruct((B * S, O), jnp.float32),
        in_specs=[vmem] * (1 + len(weights)),
        out_specs=vmem,
        compiler_params=pltpu.CompilerParams(vmem_limit_bytes=32 * 1024 * 1024),
    )(src, *weights)                                                      # (B*S, O)

    # batch-major rows -> (S, B, O), then [::3][frame_offset:] on seq, then
    # view(-1, output_dim) — all tiny strided-slice/reshape XLA ops.
    out = jnp.transpose(enc.reshape(B, S, O), (1, 0, 2))                  # (S, B, O)
    out = out[3 * frame_offset:: 3]                                       # (n_keep, B, O)
    return out.reshape(-1, O)


# ----------------------------------------------------------------------------
# parameter construction (deterministic synthetic weights, packed for the kernel)
# ----------------------------------------------------------------------------
def make_pe(max_len, dim):
    position = jnp.arange(max_len, dtype=jnp.float32)[:, None]
    div_term = jnp.exp(jnp.arange(0, dim, 2, dtype=jnp.float32)
                       * -(math.log(10000.0) / dim))
    pe = jnp.zeros((max_len, dim), jnp.float32)
    pe = pe.at[:, 0::2].set(jnp.sin(position * div_term))
    pe = pe.at[:, 1::2].set(jnp.cos(position * div_term))
    return pe


def _lin(key, fan_in, fan_out):
    kw, kb = jax.random.split(key)
    w_t = jax.random.normal(kw, (fan_in, fan_out), jnp.float32) / math.sqrt(fan_in)
    b = jax.random.normal(kb, (1, fan_out), jnp.float32) * 0.01
    return w_t, b


def init_layer(key, d_model, d_ff, heads):
    ks = jax.random.split(key, 6)
    wq, bq = _lin(ks[0], d_model, d_model)
    wk, bk = _lin(ks[1], d_model, d_model)
    wv, bv = _lin(ks[2], d_model, d_model)
    wo, bo = _lin(ks[3], d_model, d_model)
    w1, b1 = _lin(ks[4], d_model, d_ff)
    w2, b2 = _lin(ks[5], d_ff, d_model)
    # pack Q/K/V column-wise; fold the 1/sqrt(d_head) query scale into Wq/bq
    inv = 1.0 / math.sqrt(d_model // heads)
    wqkv = jnp.concatenate([wq * inv, wk, wv], axis=1)        # (D, 3D)
    bqkv = jnp.concatenate([bq * inv, bk, bv], axis=1)        # (1, 3D)
    ones = jnp.ones((1, d_model), jnp.float32)
    zeros = jnp.zeros((1, d_model), jnp.float32)
    return dict(g1=ones, be1=zeros, wqkv=wqkv, bqkv=bqkv, wo=wo, bo=bo,
                g2=ones, be2=zeros, w1=w1, b1=b1, w2=w2, b2=b2)


def init_params(key, input_dim, d_model, num_layers, heads, d_ff, output_dim,
                max_len=5000):
    keys = jax.random.split(key, 2 + num_layers)
    scale = math.sqrt(d_model)                                # PE scale folded into linear_in
    w_in, b_in = _lin(keys[0], input_dim, d_model)
    w_out, b_out = _lin(keys[1], d_model, output_dim)
    params = {"pe": make_pe(max_len, d_model),
              "w_in": w_in * scale, "b_in": b_in * scale,
              "w_out": w_out, "b_out": b_out,
              "lnf_g": jnp.ones((1, d_model), jnp.float32),
              "lnf_b": jnp.zeros((1, d_model), jnp.float32)}
    layers = [init_layer(keys[2 + i], d_model, d_ff, heads)
              for i in range(num_layers)]
    params["layers"] = {name: jnp.stack([lyr[name] for lyr in layers], axis=0)
                        for name in layers[0]}
    return params


# ----------------------------------------------------------------------------
if __name__ == "__main__":
    input_dim, d_model, heads, d_ff = 16, 32, 4, 64
    num_layers, output_dim = 2, 16
    S, B = 8, 2

    key = jax.random.PRNGKey(0)
    pkey, xkey = jax.random.split(key)
    params = init_params(pkey, input_dim, d_model, num_layers, heads, d_ff,
                         output_dim)
    src = jax.random.normal(xkey, (S, B, input_dim), jnp.float32)

    out = net_forward(src, params, heads=heads, softmax=True, frame_offset=0)
    out = jax.block_until_ready(out)

    expected_rows = len(range(0, S, 3)) * B            # ceil(S/3) * B
    assert out.shape == (expected_rows, output_dim), out.shape
    assert bool(jnp.all(jnp.isfinite(out)))
    print("KERNEL_OK")
</pallas_src>

<mosaic_0001>
module attributes {stable_mosaic.version = 11 : i64} {
  func.func @net_fused_kernel(%arg0: memref<8x2x16xf32, #tpu.memory_space<vmem>>, %arg1: memref<8x32xf32, #tpu.memory_space<vmem>>, %arg2: memref<16x32xf32, #tpu.memory_space<vmem>>, %arg3: memref<1x32xf32, #tpu.memory_space<vmem>>, %arg4: memref<2x1x32xf32, #tpu.memory_space<vmem>>, %arg5: memref<2x1x32xf32, #tpu.memory_space<vmem>>, %arg6: memref<2x32x96xf32, #tpu.memory_space<vmem>>, %arg7: memref<2x1x96xf32, #tpu.memory_space<vmem>>, %arg8: memref<2x32x32xf32, #tpu.memory_space<vmem>>, %arg9: memref<2x1x32xf32, #tpu.memory_space<vmem>>, %arg10: memref<2x1x32xf32, #tpu.memory_space<vmem>>, %arg11: memref<2x1x32xf32, #tpu.memory_space<vmem>>, %arg12: memref<2x32x64xf32, #tpu.memory_space<vmem>>, %arg13: memref<2x1x64xf32, #tpu.memory_space<vmem>>, %arg14: memref<2x64x32xf32, #tpu.memory_space<vmem>>, %arg15: memref<2x1x32xf32, #tpu.memory_space<vmem>>, %arg16: memref<1x32xf32, #tpu.memory_space<vmem>>, %arg17: memref<1x32xf32, #tpu.memory_space<vmem>>, %arg18: memref<32x16xf32, #tpu.memory_space<vmem>>, %arg19: memref<1x16xf32, #tpu.memory_space<vmem>>, %arg20: memref<16x16xf32, #tpu.memory_space<vmem>>) attributes {dimension_semantics = [], scalar_prefetch = 0 : i64, scratch_operands = 0 : i64, tpu.core_type = #tpu.core_type<tc>} {
    %c0 = arith.constant 0 : index
    %c0_0 = arith.constant 0 : index
    %c0_1 = arith.constant 0 : index
    %0 = vector.load %arg0[%c0, %c0_0, %c0_1] : memref<8x2x16xf32, #tpu.memory_space<vmem>>, vector<8x2x16xf32>
    %1 = vector.extract_strided_slice %0 {offsets = [0, 0, 0], sizes = [8, 1, 16], strides = [1, 1, 1]} : vector<8x2x16xf32> to vector<8x1x16xf32>
    %2 = vector.shape_cast %1 : vector<8x1x16xf32> to vector<8x16xf32>
    %3 = vector.extract_strided_slice %0 {offsets = [0, 1, 0], sizes = [8, 1, 16], strides = [1, 1, 1]} : vector<8x2x16xf32> to vector<8x1x16xf32>
    %4 = vector.shape_cast %3 : vector<8x1x16xf32> to vector<8x16xf32>
    %5 = tpu.concatenate %2, %4 in 0 : vector<8x16xf32>, vector<8x16xf32> -> vector<16x16xf32>
    %c0_2 = arith.constant 0 : index
    %c0_3 = arith.constant 0 : index
    %6 = vector.load %arg2[%c0_2, %c0_3] : memref<16x32xf32, #tpu.memory_space<vmem>>, vector<16x32xf32>
    %cst = arith.constant dense<0.000000e+00> : vector<16x32xf32>
    %7 = tpu.matmul %5, %6, %cst {dimension_numbers = #tpu.dot_dimension_numbers<[1], [0], [0], [1], [0, 0, 1, 1], [], []>} : vector<16x16xf32>, vector<16x32xf32>, vector<16x32xf32> -> vector<16x32xf32>
    %c0_4 = arith.constant 0 : index
    %c0_5 = arith.constant 0 : index
    %8 = vector.load %arg3[%c0_4, %c0_5] : memref<1x32xf32, #tpu.memory_space<vmem>>, vector<1x32xf32>
    %9 = vector.broadcast %8 : vector<1x32xf32> to vector<16x32xf32>
    %10 = arith.addf %7, %9 : vector<16x32xf32>
    %c0_6 = arith.constant 0 : index
    %c0_7 = arith.constant 0 : index
    %11 = vector.load %arg1[%c0_6, %c0_7] : memref<8x32xf32, #tpu.memory_space<vmem>>, vector<8x32xf32>
    %12 = tpu.concatenate %11, %11 in 0 : vector<8x32xf32>, vector<8x32xf32> -> vector<16x32xf32>
    %13 = arith.addf %10, %12 : vector<16x32xf32>
    %c0_8 = arith.constant 0 : index
    %c0_9 = arith.constant 0 : index
    %c0_10 = arith.constant 0 : index
    %14 = vector.load %arg4[%c0_8, %c0_9, %c0_10] : memref<2x1x32xf32, #tpu.memory_space<vmem>>, vector<1x1x32xf32>
    %15 = vector.shape_cast %14 : vector<1x1x32xf32> to vector<1x32xf32>
    %c0_11 = arith.constant 0 : index
    %c0_12 = arith.constant 0 : index
    %c0_13 = arith.constant 0 : index
    %16 = vector.load %arg5[%c0_11, %c0_12, %c0_13] : memref<2x1x32xf32, #tpu.memory_space<vmem>>, vector<1x1x32xf32>
    %17 = vector.shape_cast %16 : vector<1x1x32xf32> to vector<1x32xf32>
    %cst_14 = arith.constant dense<0.000000e+00> : vector<16xf32>
    %18 = vector.multi_reduction <add>, %13, %cst_14 [1] : vector<16x32xf32> to vector<16xf32>
    %19 = vector.shape_cast %18 : vector<16xf32> to vector<16x1xf32>
    %cst_15 = arith.constant 3.200000e+01 : f32
    %20 = vector.broadcast %cst_15 : f32 to vector<16x1xf32>
    %21 = arith.divf %19, %20 : vector<16x1xf32>
    %22 = vector.broadcast %21 : vector<16x1xf32> to vector<16x32xf32>
    %23 = arith.subf %13, %22 : vector<16x32xf32>
    %24 = arith.mulf %23, %23 : vector<16x32xf32>
    %cst_16 = arith.constant dense<0.000000e+00> : vector<16xf32>
    %25 = vector.multi_reduction <add>, %24, %cst_16 [1] : vector<16x32xf32> to vector<16xf32>
    %26 = vector.shape_cast %25 : vector<16xf32> to vector<16x1xf32>
    %cst_17 = arith.constant 3.200000e+01 : f32
    %27 = vector.broadcast %cst_17 : f32 to vector<16x1xf32>
    %28 = arith.divf %26, %27 : vector<16x1xf32>
    %29 = vector.broadcast %21 : vector<16x1xf32> to vector<16x32xf32>
    %30 = arith.subf %13, %29 : vector<16x32xf32>
    %cst_18 = arith.constant 9.99999997E-7 : f32
    %31 = vector.broadcast %cst_18 : f32 to vector<16x1xf32>
    %32 = arith.addf %28, %31 : vector<16x1xf32>
    %33 = math.rsqrt %32 : vector<16x1xf32>
    %34 = vector.broadcast %33 : vector<16x1xf32> to vector<16x32xf32>
    %35 = arith.mulf %30, %34 : vector<16x32xf32>
    %36 = vector.broadcast %15 : vector<1x32xf32> to vector<16x32xf32>
    %37 = arith.mulf %35, %36 : vector<16x32xf32>
    %38 = vector.broadcast %17 : vector<1x32xf32> to vector<16x32xf32>
    %39 = arith.addf %37, %38 : vector<16x32xf32>
    %c0_19 = arith.constant 0 : index
    %c0_20 = arith.constant 0 : index
    %c0_21 = arith.constant 0 : index
    %40 = vector.load %arg6[%c0_19, %c0_20, %c0_21] : memref<2x32x96xf32, #tpu.memory_space<vmem>>, vector<1x32x96xf32>
    %41 = vector.shape_cast %40 : vector<1x32x96xf32> to vector<32x96xf32>
    %cst_22 = arith.constant dense<0.000000e+00> : vector<16x96xf32>
    %42 = tpu.matmul %39, %41, %cst_22 {dimension_numbers = #tpu.dot_dimension_numbers<[1], [0], [0], [1], [0, 0, 1, 1], [], []>} : vector<16x32xf32>, vector<32x96xf32>, vector<16x96xf32> -> vector<16x96xf32>
    %c0_23 = arith.constant 0 : index
    %c0_24 = arith.constant 0 : index
    %c0_25 = arith.constant 0 : index
    %43 = vector.load %arg7[%c0_23, %c0_24, %c0_25] : memref<2x1x96xf32, #tpu.memory_space<vmem>>, vector<1x1x96xf32>
    %44 = vector.shape_cast %43 : vector<1x1x96xf32> to vector<1x96xf32>
    %45 = vector.broadcast %44 : vector<1x96xf32> to vector<16x96xf32>
    %46 = arith.addf %42, %45 : vector<16x96xf32>
    %47 = vector.extract_strided_slice %46 {offsets = [0, 0], sizes = [16, 8], strides = [1, 1]} : vector<16x96xf32> to vector<16x8xf32>
    %48 = vector.shape_cast %47 : vector<16x8xf32> to vector<2x8x8xf32>
    %49 = vector.extract_strided_slice %46 {offsets = [0, 32], sizes = [16, 8], strides = [1, 1]} : vector<16x96xf32> to vector<16x8xf32>
    %50 = vector.shape_cast %49 : vector<16x8xf32> to vector<2x8x8xf32>
    %51 = vector.extract_strided_slice %46 {offsets = [0, 64], sizes = [16, 8], strides = [1, 1]} : vector<16x96xf32> to vector<16x8xf32>
    %52 = vector.shape_cast %51 : vector<16x8xf32> to vector<2x8x8xf32>
    "tpu.trace_start"() <{level = 10 : i32, message = "bqd,bkd->bqk"}> : () -> ()
    %cst_26 = arith.constant dense<0.000000e+00> : vector<2x8x8xf32>
    %53 = tpu.matmul %48, %50, %cst_26 {dimension_numbers = #tpu.dot_dimension_numbers<[2], [2], [1], [1], [0, 0, 0, 1, 1, 1], [0], [0]>} : vector<2x8x8xf32>, vector<2x8x8xf32>, vector<2x8x8xf32> -> vector<2x8x8xf32>
    "tpu.trace_stop"() : () -> ()
    %cst_27 = arith.constant dense<0xFF800000> : vector<2x8xf32>
    %54 = vector.multi_reduction <maximumf>, %53, %cst_27 [2] : vector<2x8x8xf32> to vector<2x8xf32>
    %55 = vector.shape_cast %54 : vector<2x8xf32> to vector<2x8x1xf32>
    %56 = vector.broadcast %55 : vector<2x8x1xf32> to vector<2x8x8xf32>
    %57 = arith.subf %53, %56 : vector<2x8x8xf32>
    %58 = math.exp %57 : vector<2x8x8xf32>
    %cst_28 = arith.constant dense<0.000000e+00> : vector<2x8xf32>
    %59 = vector.multi_reduction <add>, %58, %cst_28 [2] : vector<2x8x8xf32> to vector<2x8xf32>
    %60 = vector.shape_cast %59 : vector<2x8xf32> to vector<2x8x1xf32>
    %61 = vector.broadcast %60 : vector<2x8x1xf32> to vector<2x8x8xf32>
    %62 = arith.divf %58, %61 : vector<2x8x8xf32>
    "tpu.trace_start"() <{level = 10 : i32, message = "bqk,bkd->bqd"}> : () -> ()
    %cst_29 = arith.constant dense<0.000000e+00> : vector<2x8x8xf32>
    %63 = tpu.matmul %62, %52, %cst_29 {dimension_numbers = #tpu.dot_dimension_numbers<[2], [1], [1], [2], [0, 0, 0, 1, 1, 2], [0], [0]>} : vector<2x8x8xf32>, vector<2x8x8xf32>, vector<2x8x8xf32> -> vector<2x8x8xf32>
    "tpu.trace_stop"() : () -> ()
    %64 = vector.extract_strided_slice %46 {offsets = [0, 8], sizes = [16, 8], strides = [1, 1]} : vector<16x96xf32> to vector<16x8xf32>
    %65 = vector.shape_cast %64 : vector<16x8xf32> to vector<2x8x8xf32>
    %66 = vector.extract_strided_slice %46 {offsets = [0, 40], sizes = [16, 8], strides = [1, 1]} : vector<16x96xf32> to vector<16x8xf32>
    %67 = vector.shape_cast %66 : vector<16x8xf32> to vector<2x8x8xf32>
    %68 = vector.extract_strided_slice %46 {offsets = [0, 72], sizes = [16, 8], strides = [1, 1]} : vector<16x96xf32> to vector<16x8xf32>
    %69 = vector.shape_cast %68 : vector<16x8xf32> to vector<2x8x8xf32>
    "tpu.trace_start"() <{level = 10 : i32, message = "bqd,bkd->bqk"}> : () -> ()
    %cst_30 = arith.constant dense<0.000000e+00> : vector<2x8x8xf32>
    %70 = tpu.matmul %65, %67, %cst_30 {dimension_numbers = #tpu.dot_dimension_numbers<[2], [2], [1], [1], [0, 0, 0, 1, 1, 1], [0], [0]>} : vector<2x8x8xf32>, vector<2x8x8xf32>, vector<2x8x8xf32> -> vector<2x8x8xf32>
    "tpu.trace_stop"() : () -> ()
    %cst_31 = arith.constant dense<0xFF800000> : vector<2x8xf32>
    %71 = vector.multi_reduction <maximumf>, %70, %cst_31 [2] : vector<2x8x8xf32> to vector<2x8xf32>
    %72 = vector.shape_cast %71 : vector<2x8xf32> to vector<2x8x1xf32>
    %73 = vector.broadcast %72 : vector<2x8x1xf32> to vector<2x8x8xf32>
    %74 = arith.subf %70, %73 : vector<2x8x8xf32>
    %75 = math.exp %74 : vector<2x8x8xf32>
    %cst_32 = arith.constant dense<0.000000e+00> : vector<2x8xf32>
    %76 = vector.multi_reduction <add>, %75, %cst_32 [2] : vector<2x8x8xf32> to vector<2x8xf32>
    %77 = vector.shape_cast %76 : vector<2x8xf32> to vector<2x8x1xf32>
    %78 = vector.broadcast %77 : vector<2x8x1xf32> to vector<2x8x8xf32>
    %79 = arith.divf %75, %78 : vector<2x8x8xf32>
    "tpu.trace_start"() <{level = 10 : i32, message = "bqk,bkd->bqd"}> : () -> ()
    %cst_33 = arith.constant dense<0.000000e+00> : vector<2x8x8xf32>
    %80 = tpu.matmul %79, %69, %cst_33 {dimension_numbers = #tpu.dot_dimension_numbers<[2], [1], [1], [2], [0, 0, 0, 1, 1, 2], [0], [0]>} : vector<2x8x8xf32>, vector<2x8x8xf32>, vector<2x8x8xf32> -> vector<2x8x8xf32>
    "tpu.trace_stop"() : () -> ()
    %81 = vector.extract_strided_slice %46 {offsets = [0, 16], sizes = [16, 8], strides = [1, 1]} : vector<16x96xf32> to vector<16x8xf32>
    %82 = vector.shape_cast %81 : vector<16x8xf32> to vector<2x8x8xf32>
    %83 = vector.extract_strided_slice %46 {offsets = [0, 48], sizes = [16, 8], strides = [1, 1]} : vector<16x96xf32> to vector<16x8xf32>
    %84 = vector.shape_cast %83 : vector<16x8xf32> to vector<2x8x8xf32>
    %85 = vector.extract_strided_slice %46 {offsets = [0, 80], sizes = [16, 8], strides = [1, 1]} : vector<16x96xf32> to vector<16x8xf32>
    %86 = vector.shape_cast %85 : vector<16x8xf32> to vector<2x8x8xf32>
    "tpu.trace_start"() <{level = 10 : i32, message = "bqd,bkd->bqk"}> : () -> ()
    %cst_34 = arith.constant dense<0.000000e+00> : vector<2x8x8xf32>
    %87 = tpu.matmul %82, %84, %cst_34 {dimension_numbers = #tpu.dot_dimension_numbers<[2], [2], [1], [1], [0, 0, 0, 1, 1, 1], [0], [0]>} : vector<2x8x8xf32>, vector<2x8x8xf32>, vector<2x8x8xf32> -> vector<2x8x8xf32>
    "tpu.trace_stop"() : () -> ()
    %cst_35 = arith.constant dense<0xFF800000> : vector<2x8xf32>
    %88 = vector.multi_reduction <maximumf>, %87, %cst_35 [2] : vector<2x8x8xf32> to vector<2x8xf32>
    %89 = vector.shape_cast %88 : vector<2x8xf32> to vector<2x8x1xf32>
    %90 = vector.broadcast %89 : vector<2x8x1xf32> to vector<2x8x8xf32>
    %91 = arith.subf %87, %90 : vector<2x8x8xf32>
    %92 = math.exp %91 : vector<2x8x8xf32>
    %cst_36 = arith.constant dense<0.000000e+00> : vector<2x8xf32>
    %93 = vector.multi_reduction <add>, %92, %cst_36 [2] : vector<2x8x8xf32> to vector<2x8xf32>
    %94 = vector.shape_cast %93 : vector<2x8xf32> to vector<2x8x1xf32>
    %95 = vector.broadcast %94 : vector<2x8x1xf32> to vector<2x8x8xf32>
    %96 = arith.divf %92, %95 : vector<2x8x8xf32>
    "tpu.trace_start"() <{level = 10 : i32, message = "bqk,bkd->bqd"}> : () -> ()
    %cst_37 = arith.constant dense<0.000000e+00> : vector<2x8x8xf32>
    %97 = tpu.matmul %96, %86, %cst_37 {dimension_numbers = #tpu.dot_dimension_numbers<[2], [1], [1], [2], [0, 0, 0, 1, 1, 2], [0], [0]>} : vector<2x8x8xf32>, vector<2x8x8xf32>, vector<2x8x8xf32> -> vector<2x8x8xf32>
    "tpu.trace_stop"() : () -> ()
    %98 = vector.extract_strided_slice %46 {offsets = [0, 24], sizes = [16, 8], strides = [1, 1]} : vector<16x96xf32> to vector<16x8xf32>
    %99 = vector.shape_cast %98 : vector<16x8xf32> to vector<2x8x8xf32>
    %100 = vector.extract_strided_slice %46 {offsets = [0, 56], sizes = [16, 8], strides = [1, 1]} : vector<16x96xf32> to vector<16x8xf32>
    %101 = vector.shape_cast %100 : vector<16x8xf32> to vector<2x8x8xf32>
    %102 = vector.extract_strided_slice %46 {offsets = [0, 88], sizes = [16, 8], strides = [1, 1]} : vector<16x96xf32> to vector<16x8xf32>
    %103 = vector.shape_cast %102 : vector<16x8xf32> to vector<2x8x8xf32>
    "tpu.trace_start"() <{level = 10 : i32, message = "bqd,bkd->bqk"}> : () -> ()
    %cst_38 = arith.constant dense<0.000000e+00> : vector<2x8x8xf32>
    %104 = tpu.matmul %99, %101, %cst_38 {dimension_numbers = #tpu.dot_dimension_numbers<[2], [2], [1], [1], [0, 0, 0, 1, 1, 1], [0], [0]>} : vector<2x8x8xf32>, vector<2x8x8xf32>, vector<2x8x8xf32> -> vector<2x8x8xf32>
    "tpu.trace_stop"() : () -> ()
    %cst_39 = arith.constant dense<0xFF800000> : vector<2x8xf32>
    %105 = vector.multi_reduction <maximumf>, %104, %cst_39 [2] : vector<2x8x8xf32> to vector<2x8xf32>
    %106 = vector.shape_cast %105 : vector<2x8xf32> to vector<2x8x1xf32>
    %107 = vector.broadcast %106 : vector<2x8x1xf32> to vector<2x8x8xf32>
    %108 = arith.subf %104, %107 : vector<2x8x8xf32>
    %109 = math.exp %108 : vector<2x8x8xf32>
    %cst_40 = arith.constant dense<0.000000e+00> : vector<2x8xf32>
    %110 = vector.multi_reduction <add>, %109, %cst_40 [2] : vector<2x8x8xf32> to vector<2x8xf32>
    %111 = vector.shape_cast %110 : vector<2x8xf32> to vector<2x8x1xf32>
    %112 = vector.broadcast %111 : vector<2x8x1xf32> to vector<2x8x8xf32>
    %113 = arith.divf %109, %112 : vector<2x8x8xf32>
    "tpu.trace_start"() <{level = 10 : i32, message = "bqk,bkd->bqd"}> : () -> ()
    %cst_41 = arith.constant dense<0.000000e+00> : vector<2x8x8xf32>
    %114 = tpu.matmul %113, %103, %cst_41 {dimension_numbers = #tpu.dot_dimension_numbers<[2], [1], [1], [2], [0, 0, 0, 1, 1, 2], [0], [0]>} : vector<2x8x8xf32>, vector<2x8x8xf32>, vector<2x8x8xf32> -> vector<2x8x8xf32>
    "tpu.trace_stop"() : () -> ()
    %115 = tpu.concatenate %63, %80, %97, %114 in 2 : vector<2x8x8xf32>, vector<2x8x8xf32>, vector<2x8x8xf32>, vector<2x8x8xf32> -> vector<2x8x32xf32>
    %116 = vector.shape_cast %115 : vector<2x8x32xf32> to vector<16x32xf32>
    %c0_42 = arith.constant 0 : index
    %c0_43 = arith.constant 0 : index
    %c0_44 = arith.constant 0 : index
    %117 = vector.load %arg8[%c0_42, %c0_43, %c0_44] : memref<2x32x32xf32, #tpu.memory_space<vmem>>, vector<1x32x32xf32>
    %118 = vector.shape_cast %117 : vector<1x32x32xf32> to vector<32x32xf32>
    %cst_45 = arith.constant dense<0.000000e+00> : vector<16x32xf32>
    %119 = tpu.matmul %116, %118, %cst_45 {dimension_numbers = #tpu.dot_dimension_numbers<[1], [0], [0], [1], [0, 0, 1, 1], [], []>} : vector<16x32xf32>, vector<32x32xf32>, vector<16x32xf32> -> vector<16x32xf32>
    %c0_46 = arith.constant 0 : index
    %c0_47 = arith.constant 0 : index
    %c0_48 = arith.constant 0 : index
    %120 = vector.load %arg9[%c0_46, %c0_47, %c0_48] : memref<2x1x32xf32, #tpu.memory_space<vmem>>, vector<1x1x32xf32>
    %121 = vector.shape_cast %120 : vector<1x1x32xf32> to vector<1x32xf32>
    %122 = vector.broadcast %121 : vector<1x32xf32> to vector<16x32xf32>
    %123 = arith.addf %119, %122 : vector<16x32xf32>
    %124 = arith.addf %123, %13 : vector<16x32xf32>
    %c0_49 = arith.constant 0 : index
    %c0_50 = arith.constant 0 : index
    %c0_51 = arith.constant 0 : index
    %125 = vector.load %arg10[%c0_49, %c0_50, %c0_51] : memref<2x1x32xf32, #tpu.memory_space<vmem>>, vector<1x1x32xf32>
    %126 = vector.shape_cast %125 : vector<1x1x32xf32> to vector<1x32xf32>
    %c0_52 = arith.constant 0 : index
    %c0_53 = arith.constant 0 : index
    %c0_54 = arith.constant 0 : index
    %127 = vector.load %arg11[%c0_52, %c0_53, %c0_54] : memref<2x1x32xf32, #tpu.memory_space<vmem>>, vector<1x1x32xf32>
    %128 = vector.shape_cast %127 : vector<1x1x32xf32> to vector<1x32xf32>
    %cst_55 = arith.constant dense<0.000000e+00> : vector<16xf32>
    %129 = vector.multi_reduction <add>, %124, %cst_55 [1] : vector<16x32xf32> to vector<16xf32>
    %130 = vector.shape_cast %129 : vector<16xf32> to vector<16x1xf32>
    %cst_56 = arith.constant 3.200000e+01 : f32
    %131 = vector.broadcast %cst_56 : f32 to vector<16x1xf32>
    %132 = arith.divf %130, %131 : vector<16x1xf32>
    %133 = vector.broadcast %132 : vector<16x1xf32> to vector<16x32xf32>
    %134 = arith.subf %124, %133 : vector<16x32xf32>
    %135 = arith.mulf %134, %134 : vector<16x32xf32>
    %cst_57 = arith.constant dense<0.000000e+00> : vector<16xf32>
    %136 = vector.multi_reduction <add>, %135, %cst_57 [1] : vector<16x32xf32> to vector<16xf32>
    %137 = vector.shape_cast %136 : vector<16xf32> to vector<16x1xf32>
    %cst_58 = arith.constant 3.200000e+01 : f32
    %138 = vector.broadcast %cst_58 : f32 to vector<16x1xf32>
    %139 = arith.divf %137, %138 : vector<16x1xf32>
    %140 = vector.broadcast %132 : vector<16x1xf32> to vector<16x32xf32>
    %141 = arith.subf %124, %140 : vector<16x32xf32>
    %cst_59 = arith.constant 9.99999997E-7 : f32
    %142 = vector.broadcast %cst_59 : f32 to vector<16x1xf32>
    %143 = arith.addf %139, %142 : vector<16x1xf32>
    %144 = math.rsqrt %143 : vector<16x1xf32>
    %145 = vector.broadcast %144 : vector<16x1xf32> to vector<16x32xf32>
    %146 = arith.mulf %141, %145 : vector<16x32xf32>
    %147 = vector.broadcast %126 : vector<1x32xf32> to vector<16x32xf32>
    %148 = arith.mulf %146, %147 : vector<16x32xf32>
    %149 = vector.broadcast %128 : vector<1x32xf32> to vector<16x32xf32>
    %150 = arith.addf %148, %149 : vector<16x32xf32>
    %c0_60 = arith.constant 0 : index
    %c0_61 = arith.constant 0 : index
    %c0_62 = arith.constant 0 : index
    %151 = vector.load %arg12[%c0_60, %c0_61, %c0_62] : memref<2x32x64xf32, #tpu.memory_space<vmem>>, vector<1x32x64xf32>
    %152 = vector.shape_cast %151 : vector<1x32x64xf32> to vector<32x64xf32>
    %cst_63 = arith.constant dense<0.000000e+00> : vector<16x64xf32>
    %153 = tpu.matmul %150, %152, %cst_63 {dimension_numbers = #tpu.dot_dimension_numbers<[1], [0], [0], [1], [0, 0, 1, 1], [], []>} : vector<16x32xf32>, vector<32x64xf32>, vector<16x64xf32> -> vector<16x64xf32>
    %c0_64 = arith.constant 0 : index
    %c0_65 = arith.constant 0 : index
    %c0_66 = arith.constant 0 : index
    %154 = vector.load %arg13[%c0_64, %c0_65, %c0_66] : memref<2x1x64xf32, #tpu.memory_space<vmem>>, vector<1x1x64xf32>
    %155 = vector.shape_cast %154 : vector<1x1x64xf32> to vector<1x64xf32>
    %156 = vector.broadcast %155 : vector<1x64xf32> to vector<16x64xf32>
    %157 = arith.addf %153, %156 : vector<16x64xf32>
    %cst_67 = arith.constant 0.000000e+00 : f32
    %158 = vector.broadcast %cst_67 : f32 to vector<16x64xf32>
    %159 = arith.maximumf %157, %158 : vector<16x64xf32>
    %c0_68 = arith.constant 0 : index
    %c0_69 = arith.constant 0 : index
    %c0_70 = arith.constant 0 : index
    %160 = vector.load %arg14[%c0_68, %c0_69, %c0_70] : memref<2x64x32xf32, #tpu.memory_space<vmem>>, vector<1x64x32xf32>
    %161 = vector.shape_cast %160 : vector<1x64x32xf32> to vector<64x32xf32>
    %cst_71 = arith.constant dense<0.000000e+00> : vector<16x32xf32>
    %162 = tpu.matmul %159, %161, %cst_71 {dimension_numbers = #tpu.dot_dimension_numbers<[1], [0], [0], [1], [0, 0, 1, 1], [], []>} : vector<16x64xf32>, vector<64x32xf32>, vector<16x32xf32> -> vector<16x32xf32>
    %c0_72 = arith.constant 0 : index
    %c0_73 = arith.constant 0 : index
    %c0_74 = arith.constant 0 : index
    %163 = vector.load %arg15[%c0_72, %c0_73, %c0_74] : memref<2x1x32xf32, #tpu.memory_space<vmem>>, vector<1x1x32xf32>
    %164 = vector.shape_cast %163 : vector<1x1x32xf32> to vector<1x32xf32>
    %165 = vector.broadcast %164 : vector<1x32xf32> to vector<16x32xf32>
    %166 = arith.addf %162, %165 : vector<16x32xf32>
    %167 = arith.addf %166, %124 : vector<16x32xf32>
    %c1 = arith.constant 1 : index
    %c0_75 = arith.constant 0 : index
    %c0_76 = arith.constant 0 : index
    %168 = vector.load %arg4[%c1, %c0_75, %c0_76] : memref<2x1x32xf32, #tpu.memory_space<vmem>>, vector<1x1x32xf32>
    %169 = vector.shape_cast %168 : vector<1x1x32xf32> to vector<1x32xf32>
    %c1_77 = arith.constant 1 : index
    %c0_78 = arith.constant 0 : index
    %c0_79 = arith.constant 0 : index
    %170 = vector.load %arg5[%c1_77, %c0_78, %c0_79] : memref<2x1x32xf32, #tpu.memory_space<vmem>>, vector<1x1x32xf32>
    %171 = vector.shape_cast %170 : vector<1x1x32xf32> to vector<1x32xf32>
    %cst_80 = arith.constant dense<0.000000e+00> : vector<16xf32>
    %172 = vector.multi_reduction <add>, %167, %cst_80 [1] : vector<16x32xf32> to vector<16xf32>
    %173 = vector.shape_cast %172 : vector<16xf32> to vector<16x1xf32>
    %cst_81 = arith.constant 3.200000e+01 : f32
    %174 = vector.broadcast %cst_81 : f32 to vector<16x1xf32>
    %175 = arith.divf %173, %174 : vector<16x1xf32>
    %176 = vector.broadcast %175 : vector<16x1xf32> to vector<16x32xf32>
    %177 = arith.subf %167, %176 : vector<16x32xf32>
    %178 = arith.mulf %177, %177 : vector<16x32xf32>
    %cst_82 = arith.constant dense<0.000000e+00> : vector<16xf32>
    %179 = vector.multi_reduction <add>, %178, %cst_82 [1] : vector<16x32xf32> to vector<16xf32>
    %180 = vector.shape_cast %179 : vector<16xf32> to vector<16x1xf32>
    %cst_83 = arith.constant 3.200000e+01 : f32
    %181 = vector.broadcast %cst_83 : f32 to vector<16x1xf32>
    %182 = arith.divf %180, %181 : vector<16x1xf32>
    %183 = vector.broadcast %175 : vector<16x1xf32> to vector<16x32xf32>
    %184 = arith.subf %167, %183 : vector<16x32xf32>
    %cst_84 = arith.constant 9.99999997E-7 : f32
    %185 = vector.broadcast %cst_84 : f32 to vector<16x1xf32>
    %186 = arith.addf %182, %185 : vector<16x1xf32>
    %187 = math.rsqrt %186 : vector<16x1xf32>
    %188 = vector.broadcast %187 : vector<16x1xf32> to vector<16x32xf32>
    %189 = arith.mulf %184, %188 : vector<16x32xf32>
    %190 = vector.broadcast %169 : vector<1x32xf32> to vector<16x32xf32>
    %191 = arith.mulf %189, %190 : vector<16x32xf32>
    %192 = vector.broadcast %171 : vector<1x32xf32> to vector<16x32xf32>
    %193 = arith.addf %191, %192 : vector<16x32xf32>
    %c1_85 = arith.constant 1 : index
    %c0_86 = arith.constant 0 : index
    %c0_87 = arith.constant 0 : index
    %194 = vector.load %arg6[%c1_85, %c0_86, %c0_87] : memref<2x32x96xf32, #tpu.memory_space<vmem>>, vector<1x32x96xf32>
    %195 = vector.shape_cast %194 : vector<1x32x96xf32> to vector<32x96xf32>
    %cst_88 = arith.constant dense<0.000000e+00> : vector<16x96xf32>
    %196 = tpu.matmul %193, %195, %cst_88 {dimension_numbers = #tpu.dot_dimension_numbers<[1], [0], [0], [1], [0, 0, 1, 1], [], []>} : vector<16x32xf32>, vector<32x96xf32>, vector<16x96xf32> -> vector<16x96xf32>
    %c1_89 = arith.constant 1 : index
    %c0_90 = arith.constant 0 : index
    %c0_91 = arith.constant 0 : index
    %197 = vector.load %arg7[%c1_89, %c0_90, %c0_91] : memref<2x1x96xf32, #tpu.memory_space<vmem>>, vector<1x1x96xf32>
    %198 = vector.shape_cast %197 : vector<1x1x96xf32> to vector<1x96xf32>
    %199 = vector.broadcast %198 : vector<1x96xf32> to vector<16x96xf32>
    %200 = arith.addf %196, %199 : vector<16x96xf32>
    %201 = vector.extract_strided_slice %200 {offsets = [0, 0], sizes = [16, 8], strides = [1, 1]} : vector<16x96xf32> to vector<16x8xf32>
    %202 = vector.shape_cast %201 : vector<16x8xf32> to vector<2x8x8xf32>
    %203 = vector.extract_strided_slice %200 {offsets = [0, 32], sizes = [16, 8], strides = [1, 1]} : vector<16x96xf32> to vector<16x8xf32>
    %204 = vector.shape_cast %203 : vector<16x8xf32> to vector<2x8x8xf32>
    %205 = vector.extract_strided_slice %200 {offsets = [0, 64], sizes = [16, 8], strides = [1, 1]} : vector<16x96xf32> to vector<16x8xf32>
    %206 = vector.shape_cast %205 : vector<16x8xf32> to vector<2x8x8xf32>
    "tpu.trace_start"() <{level = 10 : i32, message = "bqd,bkd->bqk"}> : () -> ()
    %cst_92 = arith.constant dense<0.000000e+00> : vector<2x8x8xf32>
    %207 = tpu.matmul %202, %204, %cst_92 {dimension_numbers = #tpu.dot_dimension_numbers<[2], [2], [1], [1], [0, 0, 0, 1, 1, 1], [0], [0]>} : vector<2x8x8xf32>, vector<2x8x8xf32>, vector<2x8x8xf32> -> vector<2x8x8xf32>
    "tpu.trace_stop"() : () -> ()
    %cst_93 = arith.constant dense<0xFF800000> : vector<2x8xf32>
    %208 = vector.multi_reduction <maximumf>, %207, %cst_93 [2] : vector<2x8x8xf32> to vector<2x8xf32>
    %209 = vector.shape_cast %208 : vector<2x8xf32> to vector<2x8x1xf32>
    %210 = vector.broadcast %209 : vector<2x8x1xf32> to vector<2x8x8xf32>
    %211 = arith.subf %207, %210 : vector<2x8x8xf32>
    %212 = math.exp %211 : vector<2x8x8xf32>
    %cst_94 = arith.constant dense<0.000000e+00> : vector<2x8xf32>
    %213 = vector.multi_reduction <add>, %212, %cst_94 [2] : vector<2x8x8xf32> to vector<2x8xf32>
    %214 = vector.shape_cast %213 : vector<2x8xf32> to vector<2x8x1xf32>
    %215 = vector.broadcast %214 : vector<2x8x1xf32> to vector<2x8x8xf32>
    %216 = arith.divf %212, %215 : vector<2x8x8xf32>
    "tpu.trace_start"() <{level = 10 : i32, message = "bqk,bkd->bqd"}> : () -> ()
    %cst_95 = arith.constant dense<0.000000e+00> : vector<2x8x8xf32>
    %217 = tpu.matmul %216, %206, %cst_95 {dimension_numbers = #tpu.dot_dimension_numbers<[2], [1], [1], [2], [0, 0, 0, 1, 1, 2], [0], [0]>} : vector<2x8x8xf32>, vector<2x8x8xf32>, vector<2x8x8xf32> -> vector<2x8x8xf32>
    "tpu.trace_stop"() : () -> ()
    %218 = vector.extract_strided_slice %200 {offsets = [0, 8], sizes = [16, 8], strides = [1, 1]} : vector<16x96xf32> to vector<16x8xf32>
    %219 = vector.shape_cast %218 : vector<16x8xf32> to vector<2x8x8xf32>
    %220 = vector.extract_strided_slice %200 {offsets = [0, 40], sizes = [16, 8], strides = [1, 1]} : vector<16x96xf32> to vector<16x8xf32>
    %221 = vector.shape_cast %220 : vector<16x8xf32> to vector<2x8x8xf32>
    %222 = vector.extract_strided_slice %200 {offsets = [0, 72], sizes = [16, 8], strides = [1, 1]} : vector<16x96xf32> to vector<16x8xf32>
    %223 = vector.shape_cast %222 : vector<16x8xf32> to vector<2x8x8xf32>
    "tpu.trace_start"() <{level = 10 : i32, message = "bqd,bkd->bqk"}> : () -> ()
    %cst_96 = arith.constant dense<0.000000e+00> : vector<2x8x8xf32>
    %224 = tpu.matmul %219, %221, %cst_96 {dimension_numbers = #tpu.dot_dimension_numbers<[2], [2], [1], [1], [0, 0, 0, 1, 1, 1], [0], [0]>} : vector<2x8x8xf32>, vector<2x8x8xf32>, vector<2x8x8xf32> -> vector<2x8x8xf32>
    "tpu.trace_stop"() : () -> ()
    %cst_97 = arith.constant dense<0xFF800000> : vector<2x8xf32>
    %225 = vector.multi_reduction <maximumf>, %224, %cst_97 [2] : vector<2x8x8xf32> to vector<2x8xf32>
    %226 = vector.shape_cast %225 : vector<2x8xf32> to vector<2x8x1xf32>
    %227 = vector.broadcast %226 : vector<2x8x1xf32> to vector<2x8x8xf32>
    %228 = arith.subf %224, %227 : vector<2x8x8xf32>
    %229 = math.exp %228 : vector<2x8x8xf32>
    %cst_98 = arith.constant dense<0.000000e+00> : vector<2x8xf32>
    %230 = vector.multi_reduction <add>, %229, %cst_98 [2] : vector<2x8x8xf32> to vector<2x8xf32>
    %231 = vector.shape_cast %230 : vector<2x8xf32> to vector<2x8x1xf32>
    %232 = vector.broadcast %231 : vector<2x8x1xf32> to vector<2x8x8xf32>
    %233 = arith.divf %229, %232 : vector<2x8x8xf32>
    "tpu.trace_start"() <{level = 10 : i32, message = "bqk,bkd->bqd"}> : () -> ()
    %cst_99 = arith.constant dense<0.000000e+00> : vector<2x8x8xf32>
    %234 = tpu.matmul %233, %223, %cst_99 {dimension_numbers = #tpu.dot_dimension_numbers<[2], [1], [1], [2], [0, 0, 0, 1, 1, 2], [0], [0]>} : vector<2x8x8xf32>, vector<2x8x8xf32>, vector<2x8x8xf32> -> vector<2x8x8xf32>
    "tpu.trace_stop"() : () -> ()
    %235 = vector.extract_strided_slice %200 {offsets = [0, 16], sizes = [16, 8], strides = [1, 1]} : vector<16x96xf32> to vector<16x8xf32>
    %236 = vector.shape_cast %235 : vector<16x8xf32> to vector<2x8x8xf32>
    %237 = vector.extract_strided_slice %200 {offsets = [0, 48], sizes = [16, 8], strides = [1, 1]} : vector<16x96xf32> to vector<16x8xf32>
    %238 = vector.shape_cast %237 : vector<16x8xf32> to vector<2x8x8xf32>
    %239 = vector.extract_strided_slice %200 {offsets = [0, 80], sizes = [16, 8], strides = [1, 1]} : vector<16x96xf32> to vector<16x8xf32>
    %240 = vector.shape_cast %239 : vector<16x8xf32> to vector<2x8x8xf32>
    "tpu.trace_start"() <{level = 10 : i32, message = "bqd,bkd->bqk"}> : () -> ()
    %cst_100 = arith.constant dense<0.000000e+00> : vector<2x8x8xf32>
    %241 = tpu.matmul %236, %238, %cst_100 {dimension_numbers = #tpu.dot_dimension_numbers<[2], [2], [1], [1], [0, 0, 0, 1, 1, 1], [0], [0]>} : vector<2x8x8xf32>, vector<2x8x8xf32>, vector<2x8x8xf32> -> vector<2x8x8xf32>
    "tpu.trace_stop"() : () -> ()
    %cst_101 = arith.constant dense<0xFF800000> : vector<2x8xf32>
    %242 = vector.multi_reduction <maximumf>, %241, %cst_101 [2] : vector<2x8x8xf32> to vector<2x8xf32>
    %243 = vector.shape_cast %242 : vector<2x8xf32> to vector<2x8x1xf32>
    %244 = vector.broadcast %243 : vector<2x8x1xf32> to vector<2x8x8xf32>
    %245 = arith.subf %241, %244 : vector<2x8x8xf32>
    %246 = math.exp %245 : vector<2x8x8xf32>
    %cst_102 = arith.constant dense<0.000000e+00> : vector<2x8xf32>
    %247 = vector.multi_reduction <add>, %246, %cst_102 [2] : vector<2x8x8xf32> to vector<2x8xf32>
    %248 = vector.shape_cast %247 : vector<2x8xf32> to vector<2x8x1xf32>
    %249 = vector.broadcast %248 : vector<2x8x1xf32> to vector<2x8x8xf32>
    %250 = arith.divf %246, %249 : vector<2x8x8xf32>
    "tpu.trace_start"() <{level = 10 : i32, message = "bqk,bkd->bqd"}> : () -> ()
    %cst_103 = arith.constant dense<0.000000e+00> : vector<2x8x8xf32>
    %251 = tpu.matmul %250, %240, %cst_103 {dimension_numbers = #tpu.dot_dimension_numbers<[2], [1], [1], [2], [0, 0, 0, 1, 1, 2], [0], [0]>} : vector<2x8x8xf32>, vector<2x8x8xf32>, vector<2x8x8xf32> -> vector<2x8x8xf32>
    "tpu.trace_stop"() : () -> ()
    %252 = vector.extract_strided_slice %200 {offsets = [0, 24], sizes = [16, 8], strides = [1, 1]} : vector<16x96xf32> to vector<16x8xf32>
    %253 = vector.shape_cast %252 : vector<16x8xf32> to vector<2x8x8xf32>
    %254 = vector.extract_strided_slice %200 {offsets = [0, 56], sizes = [16, 8], strides = [1, 1]} : vector<16x96xf32> to vector<16x8xf32>
    %255 = vector.shape_cast %254 : vector<16x8xf32> to vector<2x8x8xf32>
    %256 = vector.extract_strided_slice %200 {offsets = [0, 88], sizes = [16, 8], strides = [1, 1]} : vector<16x96xf32> to vector<16x8xf32>
    %257 = vector.shape_cast %256 : vector<16x8xf32> to vector<2x8x8xf32>
    "tpu.trace_start"() <{level = 10 : i32, message = "bqd,bkd->bqk"}> : () -> ()
    %cst_104 = arith.constant dense<0.000000e+00> : vector<2x8x8xf32>
    %258 = tpu.matmul %253, %255, %cst_104 {dimension_numbers = #tpu.dot_dimension_numbers<[2], [2], [1], [1], [0, 0, 0, 1, 1, 1], [0], [0]>} : vector<2x8x8xf32>, vector<2x8x8xf32>, vector<2x8x8xf32> -> vector<2x8x8xf32>
    "tpu.trace_stop"() : () -> ()
    %cst_105 = arith.constant dense<0xFF800000> : vector<2x8xf32>
    %259 = vector.multi_reduction <maximumf>, %258, %cst_105 [2] : vector<2x8x8xf32> to vector<2x8xf32>
    %260 = vector.shape_cast %259 : vector<2x8xf32> to vector<2x8x1xf32>
    %261 = vector.broadcast %260 : vector<2x8x1xf32> to vector<2x8x8xf32>
    %262 = arith.subf %258, %261 : vector<2x8x8xf32>
    %263 = math.exp %262 : vector<2x8x8xf32>
    %cst_106 = arith.constant dense<0.000000e+00> : vector<2x8xf32>
    %264 = vector.multi_reduction <add>, %263, %cst_106 [2] : vector<2x8x8xf32> to vector<2x8xf32>
    %265 = vector.shape_cast %264 : vector<2x8xf32> to vector<2x8x1xf32>
    %266 = vector.broadcast %265 : vector<2x8x1xf32> to vector<2x8x8xf32>
    %267 = arith.divf %263, %266 : vector<2x8x8xf32>
    "tpu.trace_start"() <{level = 10 : i32, message = "bqk,bkd->bqd"}> : () -> ()
    %cst_107 = arith.constant dense<0.000000e+00> : vector<2x8x8xf32>
    %268 = tpu.matmul %267, %257, %cst_107 {dimension_numbers = #tpu.dot_dimension_numbers<[2], [1], [1], [2], [0, 0, 0, 1, 1, 2], [0], [0]>} : vector<2x8x8xf32>, vector<2x8x8xf32>, vector<2x8x8xf32> -> vector<2x8x8xf32>
    "tpu.trace_stop"() : () -> ()
    %269 = tpu.concatenate %217, %234, %251, %268 in 2 : vector<2x8x8xf32>, vector<2x8x8xf32>, vector<2x8x8xf32>, vector<2x8x8xf32> -> vector<2x8x32xf32>
    %270 = vector.shape_cast %269 : vector<2x8x32xf32> to vector<16x32xf32>
    %c1_108 = arith.constant 1 : index
    %c0_109 = arith.constant 0 : index
    %c0_110 = arith.constant 0 : index
    %271 = vector.load %arg8[%c1_108, %c0_109, %c0_110] : memref<2x32x32xf32, #tpu.memory_space<vmem>>, vector<1x32x32xf32>
    %272 = vector.shape_cast %271 : vector<1x32x32xf32> to vector<32x32xf32>
    %cst_111 = arith.constant dense<0.000000e+00> : vector<16x32xf32>
    %273 = tpu.matmul %270, %272, %cst_111 {dimension_numbers = #tpu.dot_dimension_numbers<[1], [0], [0], [1], [0, 0, 1, 1], [], []>} : vector<16x32xf32>, vector<32x32xf32>, vector<16x32xf32> -> vector<16x32xf32>
    %c1_112 = arith.constant 1 : index
    %c0_113 = arith.constant 0 : index
    %c0_114 = arith.constant 0 : index
    %274 = vector.load %arg9[%c1_112, %c0_113, %c0_114] : memref<2x1x32xf32, #tpu.memory_space<vmem>>, vector<1x1x32xf32>
    %275 = vector.shape_cast %274 : vector<1x1x32xf32> to vector<1x32xf32>
    %276 = vector.broadcast %275 : vector<1x32xf32> to vector<16x32xf32>
    %277 = arith.addf %273, %276 : vector<16x32xf32>
    %278 = arith.addf %277, %167 : vector<16x32xf32>
    %c1_115 = arith.constant 1 : index
    %c0_116 = arith.constant 0 : index
    %c0_117 = arith.constant 0 : index
    %279 = vector.load %arg10[%c1_115, %c0_116, %c0_117] : memref<2x1x32xf32, #tpu.memory_space<vmem>>, vector<1x1x32xf32>
    %280 = vector.shape_cast %279 : vector<1x1x32xf32> to vector<1x32xf32>
    %c1_118 = arith.constant 1 : index
    %c0_119 = arith.constant 0 : index
    %c0_120 = arith.constant 0 : index
    %281 = vector.load %arg11[%c1_118, %c0_119, %c0_120] : memref<2x1x32xf32, #tpu.memory_space<vmem>>, vector<1x1x32xf32>
    %282 = vector.shape_cast %281 : vector<1x1x32xf32> to vector<1x32xf32>
    %cst_121 = arith.constant dense<0.000000e+00> : vector<16xf32>
    %283 = vector.multi_reduction <add>, %278, %cst_121 [1] : vector<16x32xf32> to vector<16xf32>
    %284 = vector.shape_cast %283 : vector<16xf32> to vector<16x1xf32>
    %cst_122 = arith.constant 3.200000e+01 : f32
    %285 = vector.broadcast %cst_122 : f32 to vector<16x1xf32>
    %286 = arith.divf %284, %285 : vector<16x1xf32>
    %287 = vector.broadcast %286 : vector<16x1xf32> to vector<16x32xf32>
    %288 = arith.subf %278, %287 : vector<16x32xf32>
    %289 = arith.mulf %288, %288 : vector<16x32xf32>
    %cst_123 = arith.constant dense<0.000000e+00> : vector<16xf32>
    %290 = vector.multi_reduction <add>, %289, %cst_123 [1] : vector<16x32xf32> to vector<16xf32>
    %291 = vector.shape_cast %290 : vector<16xf32> to vector<16x1xf32>
    %cst_124 = arith.constant 3.200000e+01 : f32
    %292 = vector.broadcast %cst_124 : f32 to vector<16x1xf32>
    %293 = arith.divf %291, %292 : vector<16x1xf32>
    %294 = vector.broadcast %286 : vector<16x1xf32> to vector<16x32xf32>
    %295 = arith.subf %278, %294 : vector<16x32xf32>
    %cst_125 = arith.constant 9.99999997E-7 : f32
    %296 = vector.broadcast %cst_125 : f32 to vector<16x1xf32>
    %297 = arith.addf %293, %296 : vector<16x1xf32>
    %298 = math.rsqrt %297 : vector<16x1xf32>
    %299 = vector.broadcast %298 : vector<16x1xf32> to vector<16x32xf32>
    %300 = arith.mulf %295, %299 : vector<16x32xf32>
    %301 = vector.broadcast %280 : vector<1x32xf32> to vector<16x32xf32>
    %302 = arith.mulf %300, %301 : vector<16x32xf32>
    %303 = vector.broadcast %282 : vector<1x32xf32> to vector<16x32xf32>
    %304 = arith.addf %302, %303 : vector<16x32xf32>
    %c1_126 = arith.constant 1 : index
    %c0_127 = arith.constant 0 : index
    %c0_128 = arith.constant 0 : index
    %305 = vector.load %arg12[%c1_126, %c0_127, %c0_128] : memref<2x32x64xf32, #tpu.memory_space<vmem>>, vector<1x32x64xf32>
    %306 = vector.shape_cast %305 : vector<1x32x64xf32> to vector<32x64xf32>
    %cst_129 = arith.constant dense<0.000000e+00> : vector<16x64xf32>
    %307 = tpu.matmul %304, %306, %cst_129 {dimension_numbers = #tpu.dot_dimension_numbers<[1], [0], [0], [1], [0, 0, 1, 1], [], []>} : vector<16x32xf32>, vector<32x64xf32>, vector<16x64xf32> -> vector<16x64xf32>
    %c1_130 = arith.constant 1 : index
    %c0_131 = arith.constant 0 : index
    %c0_132 = arith.constant 0 : index
    %308 = vector.load %arg13[%c1_130, %c0_131, %c0_132] : memref<2x1x64xf32, #tpu.memory_space<vmem>>, vector<1x1x64xf32>
    %309 = vector.shape_cast %308 : vector<1x1x64xf32> to vector<1x64xf32>
    %310 = vector.broadcast %309 : vector<1x64xf32> to vector<16x64xf32>
    %311 = arith.addf %307, %310 : vector<16x64xf32>
    %cst_133 = arith.constant 0.000000e+00 : f32
    %312 = vector.broadcast %cst_133 : f32 to vector<16x64xf32>
    %313 = arith.maximumf %311, %312 : vector<16x64xf32>
    %c1_134 = arith.constant 1 : index
    %c0_135 = arith.constant 0 : index
    %c0_136 = arith.constant 0 : index
    %314 = vector.load %arg14[%c1_134, %c0_135, %c0_136] : memref<2x64x32xf32, #tpu.memory_space<vmem>>, vector<1x64x32xf32>
    %315 = vector.shape_cast %314 : vector<1x64x32xf32> to vector<64x32xf32>
    %cst_137 = arith.constant dense<0.000000e+00> : vector<16x32xf32>
    %316 = tpu.matmul %313, %315, %cst_137 {dimension_numbers = #tpu.dot_dimension_numbers<[1], [0], [0], [1], [0, 0, 1, 1], [], []>} : vector<16x64xf32>, vector<64x32xf32>, vector<16x32xf32> -> vector<16x32xf32>
    %c1_138 = arith.constant 1 : index
    %c0_139 = arith.constant 0 : index
    %c0_140 = arith.constant 0 : index
    %317 = vector.load %arg15[%c1_138, %c0_139, %c0_140] : memref<2x1x32xf32, #tpu.memory_space<vmem>>, vector<1x1x32xf32>
    %318 = vector.shape_cast %317 : vector<1x1x32xf32> to vector<1x32xf32>
    %319 = vector.broadcast %318 : vector<1x32xf32> to vector<16x32xf32>
    %320 = arith.addf %316, %319 : vector<16x32xf32>
    %321 = arith.addf %320, %278 : vector<16x32xf32>
    %c0_141 = arith.constant 0 : index
    %c0_142 = arith.constant 0 : index
    %322 = vector.load %arg16[%c0_141, %c0_142] : memref<1x32xf32, #tpu.memory_space<vmem>>, vector<1x32xf32>
    %c0_143 = arith.constant 0 : index
    %c0_144 = arith.constant 0 : index
    %323 = vector.load %arg17[%c0_143, %c0_144] : memref<1x32xf32, #tpu.memory_space<vmem>>, vector<1x32xf32>
    %cst_145 = arith.constant dense<0.000000e+00> : vector<16xf32>
    %324 = vector.multi_reduction <add>, %321, %cst_145 [1] : vector<16x32xf32> to vector<16xf32>
    %325 = vector.shape_cast %324 : vector<16xf32> to vector<16x1xf32>
    %cst_146 = arith.constant 3.200000e+01 : f32
    %326 = vector.broadcast %cst_146 : f32 to vector<16x1xf32>
    %327 = arith.divf %325, %326 : vector<16x1xf32>
    %328 = vector.broadcast %327 : vector<16x1xf32> to vector<16x32xf32>
    %329 = arith.subf %321, %328 : vector<16x32xf32>
    %330 = arith.mulf %329, %329 : vector<16x32xf32>
    %cst_147 = arith.constant dense<0.000000e+00> : vector<16xf32>
    %331 = vector.multi_reduction <add>, %330, %cst_147 [1] : vector<16x32xf32> to vector<16xf32>
    %332 = vector.shape_cast %331 : vector<16xf32> to vector<16x1xf32>
    %cst_148 = arith.constant 3.200000e+01 : f32
    %333 = vector.broadcast %cst_148 : f32 to vector<16x1xf32>
    %334 = arith.divf %332, %333 : vector<16x1xf32>
    %335 = vector.broadcast %327 : vector<16x1xf32> to vector<16x32xf32>
    %336 = arith.subf %321, %335 : vector<16x32xf32>
    %cst_149 = arith.constant 9.99999997E-7 : f32
    %337 = vector.broadcast %cst_149 : f32 to vector<16x1xf32>
    %338 = arith.addf %334, %337 : vector<16x1xf32>
    %339 = math.rsqrt %338 : vector<16x1xf32>
    %340 = vector.broadcast %339 : vector<16x1xf32> to vector<16x32xf32>
    %341 = arith.mulf %336, %340 : vector<16x32xf32>
    %342 = vector.broadcast %322 : vector<1x32xf32> to vector<16x32xf32>
    %343 = arith.mulf %341, %342 : vector<16x32xf32>
    %344 = vector.broadcast %323 : vector<1x32xf32> to vector<16x32xf32>
    %345 = arith.addf %343, %344 : vector<16x32xf32>
    %c0_150 = arith.constant 0 : index
    %c0_151 = arith.constant 0 : index
    %346 = vector.load %arg18[%c0_150, %c0_151] : memref<32x16xf32, #tpu.memory_space<vmem>>, vector<32x16xf32>
    %cst_152 = arith.constant dense<0.000000e+00> : vector<16x16xf32>
    %347 = tpu.matmul %345, %346, %cst_152 {dimension_numbers = #tpu.dot_dimension_numbers<[1], [0], [0], [1], [0, 0, 1, 1], [], []>} : vector<16x32xf32>, vector<32x16xf32>, vector<16x16xf32> -> vector<16x16xf32>
    %c0_153 = arith.constant 0 : index
    %c0_154 = arith.constant 0 : index
    %348 = vector.load %arg19[%c0_153, %c0_154] : memref<1x16xf32, #tpu.memory_space<vmem>>, vector<1x16xf32>
    %349 = vector.broadcast %348 : vector<1x16xf32> to vector<16x16xf32>
    %350 = arith.addf %347, %349 : vector<16x16xf32>
    %351 = vector.shape_cast %350 : vector<16x16xf32> to vector<2x8x16xf32>
    %cst_155 = arith.constant dense<0xFF800000> : vector<8x16xf32>
    %352 = vector.multi_reduction <maximumf>, %351, %cst_155 [0] : vector<2x8x16xf32> to vector<8x16xf32>
    %353 = vector.shape_cast %352 : vector<8x16xf32> to vector<1x8x16xf32>
    %354 = vector.broadcast %353 : vector<1x8x16xf32> to vector<2x8x16xf32>
    %355 = arith.subf %351, %354 : vector<2x8x16xf32>
    %356 = math.exp %355 : vector<2x8x16xf32>
    %cst_156 = arith.constant dense<0.000000e+00> : vector<8x16xf32>
    %357 = vector.multi_reduction <add>, %356, %cst_156 [0] : vector<2x8x16xf32> to vector<8x16xf32>
    %358 = vector.shape_cast %357 : vector<8x16xf32> to vector<1x8x16xf32>
    %359 = math.log %358 : vector<1x8x16xf32>
    %360 = vector.broadcast %359 : vector<1x8x16xf32> to vector<2x8x16xf32>
    %361 = arith.subf %355, %360 : vector<2x8x16xf32>
    %362 = vector.shape_cast %361 : vector<2x8x16xf32> to vector<16x16xf32>
    %c0_157 = arith.constant 0 : index
    %c0_158 = arith.constant 0 : index
    %363 = vector.load %arg20[%c0_157, %c0_158] : memref<16x16xf32, #tpu.memory_space<vmem>>, vector<16x16xf32>
    tpu.vector_store %arg20[%c0_157, %c0_158], %362 {strides = array<i32>} : memref<16x16xf32, #tpu.memory_space<vmem>>, vector<16x16xf32>,
    return
  }
}

</mosaic_0001>

<bundles_post_ra>
// kernel: net_forward.1
= control target key start
LH: loop header
LB: loop body
LE: loop exit
PB: predicated region body
PF: predicated region fallthrough
CT: control target
= control target key end

     0   :  { %s5559_s0 = inlined_call_operand.vmem [shape: f32[8,2,16], index: 0, kind: input, shape index: {}]   ;;  %s5560_s1 = inlined_call_operand.vmem [shape: f32[8,32], index: 1, kind: input, shape index: {}]   ;;  %s5561_s2 = inlined_call_operand.vmem [shape: f32[16,32], index: 2, kind: input, shape index: {}]   ;;  %s5562_s3 = inlined_call_operand.vmem [shape: f32[1,32], index: 3, kind: input, shape index: {}]   ;;  %s5563_s4 = inlined_call_operand.vmem [shape: f32[2,1,32], index: 4, kind: input, shape index: {}]   ;;  %s5564_s5 = inlined_call_operand.vmem [shape: f32[2,1,32], index: 5, kind: input, shape index: {}]   ;;  %s5565_s6 = inlined_call_operand.vmem [shape: f32[2,32,96], index: 6, kind: input, shape index: {}]   ;;  %s5566_s7 = inlined_call_operand.vmem [shape: f32[2,1,96], index: 7, kind: input, shape index: {}]   ;;  %s5567_s8 = inlined_call_operand.vmem [shape: f32[2,32,32], index: 8, kind: input, shape index: {}]   ;;  %s5568_s9 = inlined_call_operand.vmem [shape: f32[2,1,32], index: 9, kind: input, shape index: {}]   ;;  %s5569_s10 = inlined_call_operand.vmem [shape: f32[2,1,32], index: 10, kind: input, shape index: {}]   ;;  %s5570_s11 = inlined_call_operand.vmem [shape: f32[2,1,32], index: 11, kind: input, shape index: {}]   ;;  %s5571_s12 = inlined_call_operand.vmem [shape: f32[2,32,64], index: 12, kind: input, shape index: {}]   ;;  %s5572_s13 = inlined_call_operand.vmem [shape: f32[2,1,64], index: 13, kind: input, shape index: {}]   ;;  %s5573_s14 = inlined_call_operand.vmem [shape: f32[2,64,32], index: 14, kind: input, shape index: {}]   ;;  %s5574_s15 = inlined_call_operand.vmem [shape: f32[2,1,32], index: 15, kind: input, shape index: {}]   ;;  %s5575_s16 = inlined_call_operand.vmem [shape: f32[1,32], index: 16, kind: input, shape index: {}]   ;;  %s5576_s17 = inlined_call_operand.vmem [shape: f32[1,32], index: 17, kind: input, shape index: {}]   ;;  %s5577_s18 = inlined_call_operand.vmem [shape: f32[32,16], index: 18, kind: input, shape index: {}]   ;;  %s5578_s19 = inlined_call_operand.hbm [shape: f32[1,16], index: 19, kind: input, shape index: {}]   ;;  %s5579_s20 = inlined_call_operand.vmem [shape: f32[16,16], index: 20, kind: output, shape index: {}]  }
   0x1   :  { %5601 = sst [smem:[#allocation5_spill]] %s5559_s0 }
   0x2   :  { %5602 = sst [smem:[#allocation6_spill]] %s5560_s1 }
   0x3   :  { %5603 = sst [smem:[#allocation7_spill]] %s5561_s2 }
   0x4   :  { %5604 = sst [smem:[#allocation8_spill]] %s5562_s3 }
   0x5   :  { %5605 = sst [smem:[#allocation9_spill]] %s5563_s4 }
   0x6   :  { %25 = vsyncpa [#allocation3], 0  ;;  %s4775_s1 = smov [#allocation2]   ;;  %s4751_s2 = scalar_lea.hbm %s5578_s19, 16 }
   0x7   :  { %s70_s22 = sshll.u32 %s4775_s1, 4  ;;  %p4752_p0 = scmp.ne.s32.totalorder %s5578_s19, %s4751_s2  ;;  %s71_s22 = int_to_ptr.vmem [resolvable:$true] %s70_s22 }
   0x8   :  { %p4755_p1 = scmp.lt.u32.totalorder %s4751_s2, %s5578_s19 }
   0xa   :  { %p4757_p2 = pnand %p4755_p1, %p4752_p0 }
   0xc   :  { %4760 = shalt.err (!%p4757_p2)
}
   0xd   :  { %s4761_s28 = scalar_lea.vmem %s71_s22, 16  ;;  %s4765_s4 = scalar_lea.vmem %s71_s22, 32 }
   0xe   :  { %p4762_p3 = scmp.ne.s32.totalorder %s71_s22, %s4761_s28  ;;  %p4766_p4 = scmp.lt.s32.totalorder %s71_s22, %s71_s22 }
   0xf   :  { %p4767_p5 = scmp.lt.s32.totalorder %s4765_s4, %s4761_s28 }
  0x11   :  { %p4768_p6 = por %p4767_p5, %p4766_p4 }
  0x13   :  { %p4769_p7 = pnand %p4768_p6, %p4762_p3 }
  0x15   :  { %4772 = shalt.err (!%p4769_p7)
}
  0x16   :  { %73 = dma.hbm_to_vmem [thread:$0]  %s5578_s19, 16, %s71_s22, [#allocation3]  }
  0x17   :  { %4773 = dma.done.wait [#allocation3], 16  }
  0x18   :  { %4774 = vsyncadd [#allocation3], 4294967280  ;;  %s5606_s1 = sld [smem:[#allocation7_spill]]  ;;  %s5607_s3 = sld [smem:[#allocation5_spill]]  ;;  %vm94_vm0 = vcmask 1041409   ;;  %vm97_vm1 = vcmask 1042434  }
  0x19   :  { %vm100_vm2 = vcmask 1043459   ;;  %vm103_vm3 = vcmask 1044484   ;;  %vm106_vm4 = vcmask 1045509   ;;  %vm109_vm5 = vcmask 1046534   ;;  %s5608_s26 = sld [smem:[#allocation8_spill]]  ;;  %s5609_s22 = sld [smem:[#allocation6_spill]] }
  0x1a   :  { %vm112_vm6 = vcmask 1047559   ;;  %vm137_vm7 = vcmask 130048   ;;  %vm222_vm8 = vcmask 261120   ;;  %v266_v59 = vld [vmem:[%s5565_s6] sm:$0xff]  ;;  %v267_v60 = vld [vmem:[%s5565_s6 + $0x8] sm:$0xff]  ;;  %v268_v61 = vld [vmem:[%s5565_s6 + $0x10] sm:$0xff] }
  0x1b   :  { %v4556_v62 = vpack.c.bf16 %v267_v60, %v266_v59  ;;  %v269_v63 = vld [vmem:[%s5565_s6 + $0x18] sm:$0xff]  ;;  %s5610_s25 = sld [smem:[#allocation9_spill]]  ;;  %vm4777_vm9 = vmmov 0   ;;  %vm361_vm10 = vcmask 64512   ;;  %s4779_s28 = smov 64   ;;  %vm1705_vm11 = vcmask 195584  }
  0x1c   :  { %s4780_s4 = smov 88   ;;  %s4781_s29 = smov 120   ;;  %vm1955_vm12 = vcmask 523264  }
  0x1d   :  { %4557 = vmatprep.subr.bf16.mxu1 %v4556_v62  ;;  %s4782_s30 = smov 56   ;;  %s5599_s0 = smov 80  }
  0x1e   :  { %v128_v0 = vld [vmem:[%s5606_s1] sm:$0xff]  ;;  %v129_v1 = vld [vmem:[%s5606_s1 + $0x8] sm:$0xff]  ;;  %4559 = vmatpush3.bf16.msra.mxu1 %v4556_v62  ;;  %s5597_s21 = smov 112   ;;  %s5593_s1 = smov 48  }
  0x1f   :  { %v77_v2 = vld [vmem:[%s5607_s3] sm:$0x3]  ;;  %v4552_v3 = vpack.c.bf16 %v129_v1, %v128_v0  ;;  %v78_v4 = vld [vmem:[%s5607_s3 + $0x2] sm:$0x3]  ;;  %v79_v5 = vld [vmem:[%s5607_s3 + $0x4] sm:$0x3]  ;;  %v4560_v0 = vpack.c.bf16 %v269_v63, %v268_v61 }
  0x20   :  { %v80_v6 = vld [vmem:[%s5607_s3 + $0x6] sm:$0x3]  ;;  %v81_v7 = vld [vmem:[%s5607_s3 + $0x8] sm:$0x3]  ;;  %v82_v8 = vld [vmem:[%s5607_s3 + $0xa] sm:$0x3] }
  0x21   :  { %4553 = vmatprep.subr.bf16.mxu0 %v4552_v3  ;;  %v83_v9 = vld [vmem:[%s5607_s3 + $0xc] sm:$0x3]  ;;  %v93_v10 = vrot.slane %v78_v4, 7  ;;  %v96_v11 = vrot.slane %v79_v5, 6  ;;  %v99_v12 = vrot.slane %v80_v6, 5  ;;  %v102_v14 = vrot.slane %v81_v7, 4  ;;  %4561 = vmatprep.subr.bf16.mxu1 %v4560_v0 }
  0x22   :  { %4555 = vmatpush3.bf16.msra.mxu0 %v4552_v3  ;;  %v84_v13 = vld [vmem:[%s5607_s3 + $0xe] sm:$0x3]  ;;  %v114_v15 = vrot.slane %v77_v2, 1  ;;  %v105_v17 = vrot.slane %v82_v8, 3  ;;  %v116_v18 = vrot.slane %v79_v5, 7  ;;  %v118_v19 = vrot.slane %v80_v6, 6  ;;  %4563 = vmatpush3.bf16.msra.mxu1 %v4560_v0 }
  0x23   :  { %v95_v16 = vsel %vm94_vm0, %v93_v10, %v77_v2  ;;  %v108_v21 = vrot.slane %v83_v9, 2  ;;  %v120_v22 = vrot.slane %v81_v7, 5  ;;  %v111_v24 = vrot.slane %v84_v13, 1  ;;  %v4024_v39 = vld [vmem:[%s5608_s26] ss:$0 sm:$0xff]  ;;  %s5591_s23 = smov 72  }
  0x24   :  { %v98_v20 = vsel %vm97_vm1, %v96_v11, %v95_v16  ;;  %v122_v25 = vrot.slane %v82_v8, 4  ;;  %v115_v26 = vsel %vm94_vm0, %v78_v4, %v114_v15  ;;  %v124_v28 = vrot.slane %v83_v9, 3  ;;  %v217_v41 = vld [vmem:[%s5609_s22] sm:$0xff]  ;;  %s4778_s22 = smov 96   ;;  %s5589_s24 = smov 104  }
  0x25   :  { %v101_v23 = vsel %vm100_vm2, %v99_v12, %v98_v20  ;;  %v117_v29 = vsel %vm97_vm1, %v116_v18, %v115_v26  ;;  %v126_v31 = vrot.slane %v84_v13, 2  ;;  %v4027_v8 = vld [vmem:[%s5610_s25] ss:$0 sm:$0xff]  ;;  %s5587_s2 = smov 40   ;;  %s5583_s3 = smov 8  }
  0x26   :  { %v104_v27 = vsel %vm103_vm3, %v102_v14, %v101_v23  ;;  %v119_v32 = vsel %vm100_vm2, %v118_v19, %v117_v29  ;;  %v4028_v10 = vld [vmem:[%s5564_s5] ss:$0 sm:$0xff]  ;;  %s5585_s26 = smov 16   ;;  %s5595_s27 = smov 24  }
  0x27   :  { %v107_v30 = vsel %vm106_vm4, %v105_v17, %v104_v27  ;;  %v121_v34 = vsel %vm103_vm3, %v120_v22, %v119_v32  ;;  %v4776_v17 = vmov 0.0   ;;  %v4029_v18 = vld [vmem:[%s5566_s7] ss:$0 sm:$0xff]  ;;  %s5618_s19 = smov 16  }
  0x28   :  { %v110_v33 = vsel %vm109_vm5, %v108_v21, %v107_v30  ;;  %v123_v36 = vsel %vm106_vm4, %v122_v25, %v121_v34  ;;  %4288 = vmatprep.subr.mxu0 %v4776_v17  ;;  %4298 = vmatprep.subr.mxu1 %v4776_v17 }
  0x29   :  { %v113_v35 = vsel %vm112_vm6, %v111_v24, %v110_v33  ;;  %v125_v37 = vsel %vm109_vm5, %v124_v28, %v123_v36 }
  0x2a   :  { %4274 = vmatprep.mubr.msk.f32.mxu0 %vm137_vm7, %v113_v35  ;;  %v127_v38 = vsel %vm112_vm6, %v126_v31, %v125_v37 }
  0x2b   :  { %4275 = vmatmul.mubr.msk.f32.vlgmr.msra.gmra.mrb[0].mxu0 %vm137_vm7, %v127_v38 }
  0x2c   :  { %4290 = vmatprep.mubr.msk.f32.mxu0 %vm4777_vm9, %v4776_v17 }
  0xfe   :  { %v4276_v40 = vpop.f32.mrb[0].mxu0 }
  0xff   :  { %v208_v42 = vpop.f32.mrb[1].mxu0  ;;  %v214_v43 = vadd.f32 %v4276_v40, %v4024_v39 }
 0x100   :  { %v209_v44 = vadd.f32 %v4024_v39, %v208_v42 }
 0x101   :  { %v4961_v46 = vadd.f32 %v217_v41, %v214_v43 }
 0x102   :  { %v4959_v45 = vadd.f32 %v217_v41, %v209_v44 }
 0x103   :  { %v226_v48 = vsel %vm222_vm8, %v4961_v46, 0.0 }
 0x104   :  { %v223_v47 = vsel %vm222_vm8, %v4959_v45, 0.0 }
 0x105   :  { %224 = vadd.xlane.f32.xlu0 %v223_v47 }
 0x109   :  { %227 = vadd.xlane.f32.xlu0 %v226_v48 }
 0x192   :  { %v225_v49 = vpop.xlane.xlu0 %224 }
 0x193   :  { %v230_v50 = vmul.f32 0.03125, %v225_v49 }
 0x195   :  { %v232_v51 = vsub.f32 %v4959_v45, %v230_v50 }
 0x196   :  { %v228_v52 = vpop.xlane.xlu0 %227 }
 0x197   :  { %v231_v53 = vmul.f32 0.03125, %v228_v52  ;;  %v234_v54 = vmul.f32 %v232_v51, %v232_v51 }
 0x199   :  { %v233_v55 = vsub.f32 %v4961_v46, %v231_v53  ;;  %v236_v56 = vsel %vm222_vm8, %v234_v54, 0.0 }
 0x19a   :  { %237 = vadd.xlane.f32.xlu1 %v236_v56 }
 0x19b   :  { %v235_v57 = vmul.f32 %v233_v55, %v233_v55 }
 0x19d   :  { %v239_v58 = vsel %vm222_vm8, %v235_v57, 0.0 }
 0x19e   :  { %240 = vadd.xlane.f32.xlu1 %v239_v58 }
 0x227   :  { %v238_v1 = vpop.xlane.xlu1 %237 }
 0x228   :  { %v242_v2 = vmul.f32 0.03125, %v238_v1 }
 0x22a   :  { %v244_v3 = vadd.f32 1e-06, %v242_v2 }
 0x22b   :  { %v241_v4 = vpop.xlane.xlu1 %240 }
 0x22c   :  { %4661 = vrsqrt.f32 %v244_v3  ;;  %v243_v5 = vmul.f32 0.03125, %v241_v4 }
 0x22e   :  { %v245_v6 = vadd.f32 1e-06, %v243_v5 }
 0x230   :  { %4663 = vrsqrt.f32 %v245_v6 }
 0x236   :  { %v4662_v7 = vpop.eup %4661 }
 0x237   :  { %v248_v9 = vmul.f32 %v4662_v7, %v232_v51 }
 0x239   :  { %v256_v11 = vmul.f32 %v4027_v8, %v248_v9 }
 0x23a   :  { %v4664_v12 = vpop.eup %4663 }
 0x23b   :  { %v249_v13 = vmul.f32 %v4664_v12, %v233_v55  ;;  %v264_v14 = vadd.f32 %v4028_v10, %v256_v11 }
 0x23d   :  { %v257_v15 = vmul.f32 %v4027_v8, %v249_v13  ;;  %4285 = vmatprep.mubr.msk.f32.mxu1 %vm222_vm8, %v264_v14 }
 0x23f   :  { %v265_v16 = vadd.f32 %v4028_v10, %v257_v15 }
 0x241   :  { %4286 = vmatmul.mubr.msk.f32.vlgmr.msra.gmra.mrb[0].mxu1 %vm222_vm8, %v265_v16 }
 0x242   :  { %4300 = vmatprep.mubr.msk.f32.mxu1 %vm4777_vm9, %v4776_v17 }
 0x314   :  { %v4287_v19 = vpop.f32.mrb[0].mxu1 }
 0x315   :  { %v5000_v20 = vadd.f32 %v4287_v19, %v4029_v18  ;;  %v349_v21 = vpop.f32.mrb[1].mxu1 }
 0x316   :  { %v5002_v22 = vadd.f32 %v4029_v18, %v349_v21 }
 0x317   :  { %437 = vrot.lane.b32.xlu1 %v5000_v20, %s4778_s22 }
 0x318   :  { %359 = vrot.lane.b32.xlu0 %v5002_v22, %s4778_s22 }
 0x389   :  { %v438_v24 = vpop.permute.xlu1 %437 }
 0x38a   :  { %v360_v23 = vpop.permute.xlu0 %359 }
 0x38b   :  { %4289 = vmatpush3.xpose.msk.msra.mxu0 %vm361_vm10, %v360_v23 }
 0x38c   :  { %4293 = vmatprep.subr.mxu0 %v4776_v17 }
 0x38e   :  { %4291 = vmatmul.mubr.msk.f32.vlgmr.msra.gmra.mrb[2].mxu0 %vm361_vm10, %v5002_v22 }
 0x38f   :  { %4294 = vmatpush3.xpose.msk.msra.mxu0 %vm361_vm10, %v438_v24  ;;  %4295 = vmatprep.mubr.msk.f32.mxu0 %vm4777_vm9, %v4776_v17 }
 0x390   :  { %4303 = vmatprep.subr.mxu0 %v4776_v17 }
 0x392   :  { %4296 = vmatmul.mubr.msk.f32.vlgmr.msra.gmra.mrb[4].mxu0 %vm361_vm10, %v5000_v20 }
 0x393   :  { %4305 = vmatprep.mubr.msk.f32.mxu0 %vm4777_vm9, %v4776_v17 }
 0x461   :  { %v432_v25 = vpop.f32.mrb[2].mxu0 }
 0x462   :  { %v4292_v26 = vpop.f32.mrb[3].mxu0  ;;  %v513_v27 = vsel %vm361_vm10, %v432_v25, -inf }
 0x463   :  { %514 = vmax.xlane.f32.xlu1 %v513_v27 }
 0x465   :  { %v509_v28 = vpop.f32.mrb[4].mxu0 }
 0x466   :  { %v4297_v29 = vpop.f32.mrb[5].mxu0  ;;  %v516_v30 = vsel %vm361_vm10, %v509_v28, -inf }
 0x467   :  { %517 = vmax.xlane.f32.xlu0 %v516_v30 }
 0x474   :  { %611 = vrot.lane.b32.xlu1 %v5000_v20, %s4779_s28 }
 0x478   :  { %689 = vrot.lane.b32.xlu1 %v5002_v22, %s4780_s4 }
 0x47c   :  { %767 = vrot.lane.b32.xlu1 %v5000_v20, %s4780_s4 }
 0x47d   :  { %535 = vrot.lane.b32.xlu0 %v5002_v22, %s4779_s28 }
 0x4f0   :  { %v515_v31 = vpop.xlane.xlu1 %514 }
 0x4f1   :  { %v519_v32 = vsub.f32 %v432_v25, %v515_v31 }
 0x4f3   :  { %v521_v33 = vmul.f32 1.442695, %v519_v32 }
 0x4f4   :  { %v612_v34 = vpop.permute.xlu1 %611  ;;  %v518_v35 = vpop.xlane.xlu0 %517 }
 0x4f5   :  { %4665 = vpow2.f32 %v521_v33  ;;  %v520_v36 = vsub.f32 %v509_v28, %v518_v35  ;;  %4304 = vmatpush3.msra.mxu0 %v612_v34 }
 0x4f6   :  { %4313 = vmatprep.subr.mxu0 %v4776_v17 }
 0x4f7   :  { %v523_v37 = vmul.f32 1.442695, %v520_v36 }
 0x4f8   :  { %v536_v38 = vpop.permute.xlu0 %535  ;;  %v690_v43 = vpop.permute.xlu1 %689 }
 0x4f9   :  { %4667 = vpow2.f32 %v523_v37  ;;  %4299 = vmatpush3.msra.mxu1 %v536_v38 }
 0x4fa   :  { %4308 = vmatprep.subr.mxu1 %v4776_v17 }
 0x4fc   :  { %v768_v44 = vpop.permute.xlu1 %767 }
 0x4ff   :  { %v4666_v39 = vpop.eup %4665 }
 0x500   :  { %v525_v40 = vsel %vm361_vm10, %v4666_v39, 0.0 }
 0x501   :  { %526 = vadd.xlane.f32.xlu0 %v525_v40 }
 0x503   :  { %v4668_v41 = vpop.eup %4667 }
 0x504   :  { %v528_v42 = vsel %vm361_vm10, %v4668_v41, 0.0 }
 0x505   :  { %529 = vadd.xlane.f32.xlu1 %v528_v42 }
 0x516   :  { %765 = vrot.lane.b32.xlu1 %v5000_v20, %s4781_s29 }
 0x517   :  { %687 = vrot.lane.b32.xlu0 %v5002_v22, %s4781_s29 }
 0x58e   :  { %v527_v47 = vpop.xlane.xlu0 %526 }
 0x58f   :  { %4669 = vrcp.f32 %v527_v47 }
 0x592   :  { %v530_v48 = vpop.xlane.xlu1 %529  ;;  %v688_v53 = vpop.permute.xlu0 %687 }
 0x593   :  { %4671 = vrcp.f32 %v530_v48 }
 0x596   :  { %v766_v54 = vpop.permute.xlu1 %765 }
 0x599   :  { %v4670_v49 = vpop.eup %4669 }
 0x59a   :  { %v532_v50 = vmul.f32 %v4670_v49, %v4666_v39 }
 0x59c   :  { %4301 = vmatmul.mubr.msk.f32.vlgmr.msra.gmra.mrb[2].mxu1 %vm361_vm10, %v532_v50 }
 0x59d   :  { %v4672_v51 = vpop.eup %4671  ;;  %4309 = vmatpush3.xpose.msk.msra.mxu1 %vm361_vm10, %v690_v43  ;;  %4310 = vmatprep.mubr.msk.f32.mxu1 %vm4777_vm9, %v4776_v17 }
 0x59e   :  { %v534_v52 = vmul.f32 %v4672_v51, %v4668_v41  ;;  %4318 = vmatprep.subr.mxu1 %v4776_v17 }
 0x5a0   :  { %4306 = vmatmul.mubr.msk.f32.vlgmr.msra.gmra.mrb[6].mxu0 %vm361_vm10, %v534_v52  ;;  %4311 = vmatmul.mubr.msk.f32.vlgmr.msra.gmra.mrb[4].mxu1 %vm361_vm10, %v688_v53 }
 0x5a1   :  { %4314 = vmatpush3.xpose.msk.msra.mxu0 %vm361_vm10, %v768_v44  ;;  %4315 = vmatprep.mubr.msk.f32.mxu0 %vm4777_vm9, %v4776_v17 }
 0x5a2   :  { %4323 = vmatprep.subr.mxu0 %v4776_v17  ;;  %4320 = vmatprep.mubr.msk.f32.mxu1 %vm4777_vm9, %v4776_v17 }
 0x5a4   :  { %4316 = vmatmul.mubr.msk.f32.vlgmr.msra.gmra.mrb[8].mxu0 %vm361_vm10, %v766_v54 }
 0x5a5   :  { %4325 = vmatprep.mubr.msk.f32.mxu0 %vm4777_vm9, %v4776_v17 }
 0x66f   :  { %v5054_v55 = vpop.f32.mrb[2].mxu1 }
 0x670   :  { %v4302_v56 = vpop.f32.mrb[3].mxu1 }
 0x673   :  { %v5056_v57 = vpop.f32.mrb[6].mxu0  ;;  %v761_v58 = vpop.f32.mrb[4].mxu1 }
 0x674   :  { %v4307_v59 = vpop.f32.mrb[7].mxu0  ;;  %v4312_v60 = vpop.f32.mrb[5].mxu1  ;;  %v843_v61 = vsel %vm361_vm10, %v761_v58, -inf }
 0x675   :  { %844 = vmax.xlane.f32.xlu0 %v843_v61 }
 0x677   :  { %v839_v62 = vpop.f32.mrb[8].mxu0 }
 0x678   :  { %v4317_v63 = vpop.f32.mrb[9].mxu0  ;;  %v846_v0 = vsel %vm361_vm10, %v839_v62, -inf }
 0x679   :  { %847 = vmax.xlane.f32.xlu1 %v846_v0 }
 0x68a   :  { %941 = vrot.lane.b32.xlu1 %v5000_v20, %s4782_s30 }
 0x68b   :  { %865 = vrot.lane.b32.xlu0 %v5002_v22, %s4782_s30 }
 0x68e   :  { %1019 = vrot.lane.b32.xlu1 %v5002_v22, %s5599_s0 }
 0x692   :  { %1097 = vrot.lane.b32.xlu1 %v5000_v20, %s5599_s0 }
 0x696   :  { %1095 = vrot.lane.b32.xlu1 %v5000_v20, %s5597_s21 }
 0x702   :  { %v845_v1 = vpop.xlane.xlu0 %844 }
 0x703   :  { %v849_v2 = vsub.f32 %v761_v58, %v845_v1 }
 0x705   :  { %v851_v3 = vmul.f32 1.442695, %v849_v2 }
 0x706   :  { %v866_v4 = vpop.permute.xlu0 %865  ;;  %v848_v5 = vpop.xlane.xlu1 %847 }
 0x707   :  { %4673 = vpow2.f32 %v851_v3  ;;  %v850_v6 = vsub.f32 %v839_v62, %v848_v5  ;;  %4319 = vmatpush3.msra.mxu1 %v866_v4 }
 0x708   :  { %4328 = vmatprep.subr.mxu1 %v4776_v17 }
 0x709   :  { %v853_v7 = vmul.f32 1.442695, %v850_v6 }
 0x70a   :  { %v942_v8 = vpop.permute.xlu1 %941 }
 0x70b   :  { %4675 = vpow2.f32 %v853_v7  ;;  %4324 = vmatpush3.msra.mxu0 %v942_v8 }
 0x70c   :  { %4333 = vmatprep.subr.mxu0 %v4776_v17 }
 0x70e   :  { %v1020_v15 = vpop.permute.xlu1 %1019 }
 0x711   :  { %v4674_v9 = vpop.eup %4673 }
 0x712   :  { %v855_v10 = vsel %vm361_vm10, %v4674_v9, 0.0  ;;  %v1098_v21 = vpop.permute.xlu1 %1097 }
 0x713   :  { %856 = vadd.xlane.f32.xlu0 %v855_v10 }
 0x715   :  { %v4676_v11 = vpop.eup %4675 }
 0x716   :  { %v858_v12 = vsel %vm361_vm10, %v4676_v11, 0.0  ;;  %v1096_v25 = vpop.permute.xlu1 %1095 }
 0x717   :  { %859 = vadd.xlane.f32.xlu0 %v858_v12 }
 0x72d   :  { %1017 = vrot.lane.b32.xlu0 %v5002_v22, %s5597_s21 }
 0x7a0   :  { %v857_v13 = vpop.xlane.xlu0 %856 }
 0x7a1   :  { %4677 = vrcp.f32 %v857_v13 }
 0x7a4   :  { %v860_v14 = vpop.xlane.xlu0 %859 }
 0x7a5   :  { %4679 = vrcp.f32 %v860_v14 }
 0x7a8   :  { %v1018_v24 = vpop.permute.xlu0 %1017 }
 0x7ab   :  { %v4678_v16 = vpop.eup %4677 }
 0x7ac   :  { %v862_v18 = vmul.f32 %v4678_v16, %v4674_v9 }
 0x7ae   :  { %4321 = vmatmul.mubr.msk.f32.vlgmr.msra.gmra.mrb[6].mxu1 %vm361_vm10, %v862_v18 }
 0x7af   :  { %v4680_v19 = vpop.eup %4679  ;;  %4329 = vmatpush3.xpose.msk.msra.mxu1 %vm361_vm10, %v1020_v15  ;;  %4330 = vmatprep.mubr.msk.f32.mxu1 %vm4777_vm9, %v4776_v17 }
 0x7b0   :  { %v864_v23 = vmul.f32 %v4680_v19, %v4676_v11  ;;  %4338 = vmatprep.subr.mxu1 %v4776_v17 }
 0x7b2   :  { %4326 = vmatmul.mubr.msk.f32.vlgmr.msra.gmra.mrb[10].mxu0 %vm361_vm10, %v864_v23  ;;  %4331 = vmatmul.mubr.msk.f32.vlgmr.msra.gmra.mrb[8].mxu1 %vm361_vm10, %v1018_v24 }
 0x7b3   :  { %4334 = vmatpush3.xpose.msk.msra.mxu0 %vm361_vm10, %v1098_v21  ;;  %4335 = vmatprep.mubr.msk.f32.mxu0 %vm4777_vm9, %v4776_v17 }
 0x7b4   :  { %4343 = vmatprep.subr.mxu0 %v4776_v17  ;;  %4340 = vmatprep.mubr.msk.f32.mxu1 %vm4777_vm9, %v4776_v17 }
 0x7b6   :  { %4336 = vmatmul.mubr.msk.f32.vlgmr.msra.gmra.mrb[12].mxu0 %vm361_vm10, %v1096_v25 }
 0x7b7   :  { %4345 = vmatprep.mubr.msk.f32.mxu0 %vm4777_vm9, %v4776_v17 }
 0x881   :  { %v5092_v26 = vpop.f32.mrb[6].mxu1 }
 0x882   :  { %v4322_v27 = vpop.f32.mrb[7].mxu1 }
 0x885   :  { %v5094_v28 = vpop.f32.mrb[10].mxu0  ;;  %v1091_v29 = vpop.f32.mrb[8].mxu1 }
 0x886   :  { %v4327_v30 = vpop.f32.mrb[11].mxu0  ;;  %v4332_v31 = vpop.f32.mrb[9].mxu1  ;;  %v1173_v32 = vsel %vm361_vm10, %v1091_v29, -inf }
 0x887   :  { %1174 = vmax.xlane.f32.xlu0 %v1173_v32  ;;  %v1710_v30 = vld [vmem:[%s5567_s8 + $0x10] sm:$0xff]  ;;  %v1711_v31 = vld [vmem:[%s5567_s8 + $0x18] sm:$0xff] }
 0x888   :  { %v4568_v32 = vpack.c.bf16 %v1711_v31, %v1710_v30 }
 0x889   :  { %v1169_v33 = vpop.f32.mrb[12].mxu0 }
 0x88a   :  { %v4337_v34 = vpop.f32.mrb[13].mxu0  ;;  %v1176_v35 = vsel %vm361_vm10, %v1169_v33, -inf }
 0x88b   :  { %1177 = vmax.xlane.f32.xlu1 %v1176_v35 }
 0x89c   :  { %1271 = vrot.lane.b32.xlu1 %v5000_v20, %s5593_s1 }
 0x89d   :  { %1195 = vrot.lane.b32.xlu0 %v5002_v22, %s5593_s1 }
 0x8a0   :  { %1349 = vrot.lane.b32.xlu1 %v5002_v22, %s5591_s23 }
 0x8a4   :  { %1427 = vrot.lane.b32.xlu1 %v5000_v20, %s5591_s23 }
 0x8a8   :  { %1425 = vrot.lane.b32.xlu1 %v5000_v20, %s5589_s24 }
 0x914   :  { %v1175_v36 = vpop.xlane.xlu0 %1174 }
 0x915   :  { %v1179_v37 = vsub.f32 %v1091_v29, %v1175_v36 }
 0x917   :  { %v1181_v38 = vmul.f32 1.442695, %v1179_v37 }
 0x918   :  { %v1196_v39 = vpop.permute.xlu0 %1195  ;;  %v1178_v40 = vpop.xlane.xlu1 %1177 }
 0x919   :  { %4681 = vpow2.f32 %v1181_v38  ;;  %v1180_v41 = vsub.f32 %v1169_v33, %v1178_v40  ;;  %4339 = vmatpush3.msra.mxu1 %v1196_v39 }
 0x91a   :  { %4348 = vmatprep.subr.mxu1 %v4776_v17 }
 0x91b   :  { %v1183_v42 = vmul.f32 1.442695, %v1180_v41 }
 0x91c   :  { %v1272_v43 = vpop.permute.xlu1 %1271 }
 0x91d   :  { %4683 = vpow2.f32 %v1183_v42  ;;  %4344 = vmatpush3.msra.mxu0 %v1272_v43 }
 0x91e   :  { %4353 = vmatprep.subr.mxu0 %v4776_v17 }
 0x920   :  { %v1350_v52 = vpop.permute.xlu1 %1349 }
 0x923   :  { %v4682_v44 = vpop.eup %4681 }
 0x924   :  { %v1185_v47 = vsel %vm361_vm10, %v4682_v44, 0.0  ;;  %v1428_v58 = vpop.permute.xlu1 %1427 }
 0x925   :  { %1186 = vadd.xlane.f32.xlu0 %v1185_v47 }
 0x927   :  { %v4684_v48 = vpop.eup %4683 }
 0x928   :  { %v1188_v49 = vsel %vm361_vm10, %v4684_v48, 0.0  ;;  %v1426_v61 = vpop.permute.xlu1 %1425 }
 0x929   :  { %1189 = vadd.xlane.f32.xlu0 %v1188_v49 }
 0x93f   :  { %1347 = vrot.lane.b32.xlu0 %v5002_v22, %s5589_s24 }
 0x9b2   :  { %v1187_v50 = vpop.xlane.xlu0 %1186 }
 0x9b3   :  { %4685 = vrcp.f32 %v1187_v50 }
 0x9b6   :  { %v1190_v51 = vpop.xlane.xlu0 %1189 }
 0x9b7   :  { %4687 = vrcp.f32 %v1190_v51 }
 0x9ba   :  { %v1348_v60 = vpop.permute.xlu0 %1347 }
 0x9bd   :  { %v4686_v53 = vpop.eup %4685 }
 0x9be   :  { %v1192_v54 = vmul.f32 %v4686_v53, %v4682_v44 }
 0x9c0   :  { %4341 = vmatmul.mubr.msk.f32.vlgmr.msra.gmra.mrb[10].mxu1 %vm361_vm10, %v1192_v54 }
 0x9c1   :  { %v4688_v56 = vpop.eup %4687  ;;  %4349 = vmatpush3.xpose.msk.msra.mxu1 %vm361_vm10, %v1350_v52  ;;  %4350 = vmatprep.mubr.msk.f32.mxu1 %vm4777_vm9, %v4776_v17 }
 0x9c2   :  { %v1194_v59 = vmul.f32 %v4688_v56, %v4684_v48  ;;  %4358 = vmatprep.subr.mxu1 %v4776_v17 }
 0x9c4   :  { %4346 = vmatmul.mubr.msk.f32.vlgmr.msra.gmra.mrb[14].mxu0 %vm361_vm10, %v1194_v59  ;;  %4351 = vmatmul.mubr.msk.f32.vlgmr.msra.gmra.mrb[12].mxu1 %vm361_vm10, %v1348_v60 }
 0x9c5   :  { %4354 = vmatpush3.xpose.msk.msra.mxu0 %vm361_vm10, %v1428_v58  ;;  %4355 = vmatprep.mubr.msk.f32.mxu0 %vm4777_vm9, %v4776_v17 }
 0x9c6   :  { %4363 = vmatprep.subr.mxu0 %v4776_v17  ;;  %4360 = vmatprep.mubr.msk.f32.mxu1 %vm4777_vm9, %v4776_v17 }
 0x9c8   :  { %4356 = vmatmul.mubr.msk.f32.vlgmr.msra.gmra.mrb[16].mxu0 %vm361_vm10, %v1426_v61 }
 0x9c9   :  { %4365 = vmatprep.mubr.msk.f32.mxu0 %vm4777_vm9, %v4776_v17 }
 0xa93   :  { %v1267_v62 = vpop.f32.mrb[10].mxu1 }
 0xa94   :  { %v4342_v63 = vpop.f32.mrb[11].mxu1 }
 0xa97   :  { %v1343_v0 = vpop.f32.mrb[14].mxu0  ;;  %v1421_v1 = vpop.f32.mrb[12].mxu1 }
 0xa98   :  { %v4347_v2 = vpop.f32.mrb[15].mxu0  ;;  %v4352_v3 = vpop.f32.mrb[13].mxu1  ;;  %v1503_v4 = vsel %vm361_vm10, %v1421_v1, -inf }
 0xa99   :  { %1504 = vmax.xlane.f32.xlu0 %v1503_v4  ;;  %v1846_v4 = vld [vmem:[%s5571_s12] sm:$0xff] }
 0xa9b   :  { %v1499_v5 = vpop.f32.mrb[16].mxu0 }
 0xa9c   :  { %v4357_v6 = vpop.f32.mrb[17].mxu0  ;;  %v1506_v7 = vsel %vm361_vm10, %v1499_v5, -inf }
 0xa9d   :  { %1507 = vmax.xlane.f32.xlu1 %v1506_v7  ;;  %v1848_v7 = vld [vmem:[%s5571_s12 + $0x10] sm:$0xff] }
 0xaae   :  { %1601 = vrot.lane.b32.xlu1 %v5000_v20, %s5587_s2 }
 0xab2   :  { %1679 = vrot.lane.b32.xlu1 %v5092_v26, %s5583_s3 }
 0xab6   :  { %1681 = vrot.lane.b32.xlu1 %v5094_v28, %s5583_s3  ;;  %v1709_v28 = vld [vmem:[%s5567_s8 + $0x8] sm:$0xff]  ;;  %s5619_s3 = smov 24  }
 0xaba   :  { %1689 = vrot.lane.b32.xlu1 %v1343_v0, %s5585_s26 }
 0xb26   :  { %v1505_v8 = vpop.xlane.xlu0 %1504 }
 0xb27   :  { %v1509_v9 = vsub.f32 %v1421_v1, %v1505_v8  ;;  %v1849_v8 = vld [vmem:[%s5571_s12 + $0x18] sm:$0xff] }
 0xb29   :  { %v1511_v10 = vmul.f32 1.442695, %v1509_v9  ;;  %v4576_v9 = vpack.c.bf16 %v1849_v8, %v1848_v7 }
 0xb2a   :  { %v1508_v11 = vpop.xlane.xlu1 %1507 }
 0xb2b   :  { %4689 = vpow2.f32 %v1511_v10  ;;  %v1510_v12 = vsub.f32 %v1499_v5, %v1508_v11  ;;  %v1847_v5 = vld [vmem:[%s5571_s12 + $0x8] sm:$0xff]  ;;  %v1940_v10 = vld [vmem:[%s5573_s14] sm:$0xff] }
 0xb2c   :  { %v4572_v6 = vpack.c.bf16 %v1847_v5, %v1846_v4  ;;  %v1941_v11 = vld [vmem:[%s5573_s14 + $0x8] sm:$0xff]  ;;  %v4073_v4 = vld [vmem:[%s5565_s6 + $0x30] sm:$0xff]  ;;  %v4074_v5 = vld [vmem:[%s5565_s6 + $0x38] sm:$0xff] }
 0xb2d   :  { %v1513_v13 = vmul.f32 1.442695, %v1510_v12  ;;  %v1942_v12 = vld [vmem:[%s5573_s14 + $0x10] sm:$0xff] }
 0xb2e   :  { %v1602_v14 = vpop.permute.xlu1 %1601 }
 0xb2f   :  { %4691 = vpow2.f32 %v1513_v13  ;;  %4364 = vmatpush3.msra.mxu0 %v1602_v14  ;;  %v4580_v13 = vpack.c.bf16 %v1941_v11, %v1940_v10  ;;  %v1943_v14 = vld [vmem:[%s5573_s14 + $0x18] sm:$0xff] }
 0xb30   :  { %4573 = vmatprep.subr.bf16.mxu0 %v4572_v6 }
 0xb32   :  { %v1680_v37 = vpop.permute.xlu1 %1679 }
 0xb33   :  { %v1701_v40 = vsel %vm361_vm10, %v5054_v55, %v1680_v37  ;;  %v4056_v55 = vld [vmem:[%s5568_s9] ss:$0 sm:$0xff]  ;;  %v1947_v37 = vld [vmem:[%s5573_s14 + $0x38] sm:$0xff] }
 0xb35   :  { %v4690_v20 = vpop.eup %4689 }
 0xb36   :  { %v1515_v15 = vsel %vm361_vm10, %v4690_v20, 0.0  ;;  %v1682_v38 = vpop.permute.xlu1 %1681 }
 0xb37   :  { %1516 = vadd.xlane.f32.xlu0 %v1515_v15  ;;  %v1702_v47 = vsel %vm361_vm10, %v5056_v57, %v1682_v38  ;;  %v1944_v15 = vld [vmem:[%s5573_s14 + $0x20] sm:$0xff] }
 0xb39   :  { %v4692_v16 = vpop.eup %4691 }
 0xb3a   :  { %v1518_v18 = vsel %vm361_vm10, %v4692_v16, 0.0  ;;  %v1690_v41 = vpop.permute.xlu1 %1689 }
 0xb3b   :  { %1519 = vadd.xlane.f32.xlu0 %v1518_v18  ;;  %v1704_v48 = vsel %vm137_vm7, %v1702_v47, %v1690_v41 }
 0xb51   :  { %1525 = vrot.lane.b32.xlu0 %v5002_v22, %s5587_s2  ;;  %v1708_v22 = vld [vmem:[%s5567_s8] sm:$0xff] }
 0xb52   :  { %v4564_v29 = vpack.c.bf16 %v1709_v28, %v1708_v22  ;;  %v4059_v22 = vld [vmem:[%s5569_s10] ss:$0 sm:$0xff] }
 0xb55   :  { %1687 = vrot.lane.b32.xlu0 %v1267_v62, %s5585_s26 }
 0xbc4   :  { %v1517_v19 = vpop.xlane.xlu0 %1516 }
 0xbc5   :  { %4693 = vrcp.f32 %v1517_v19 }
 0xbc8   :  { %v1520_v21 = vpop.xlane.xlu0 %1519 }
 0xbc9   :  { %4695 = vrcp.f32 %v1520_v21 }
 0xbcc   :  { %v1526_v23 = vpop.permute.xlu0 %1525 }
 0xbcd   :  { %4359 = vmatpush3.msra.mxu1 %v1526_v23 }
 0xbce   :  { %4565 = vmatprep.subr.bf16.mxu1 %v4564_v29 }
 0xbcf   :  { %v4694_v24 = vpop.eup %4693 }
 0xbd0   :  { %v1522_v25 = vmul.f32 %v4694_v24, %v4690_v20  ;;  %v1688_v39 = vpop.permute.xlu0 %1687  ;;  %v4584_v20 = vpack.c.bf16 %v1943_v14, %v1942_v12  ;;  %v4069_v14 = vld [vmem:[%s5610_s25 + $0x1] ss:$0 sm:$0xff] }
 0xbd1   :  { %v1703_v42 = vsel %vm137_vm7, %v1701_v40, %v1688_v39  ;;  %v4061_v39 = vld [vmem:[%s5572_s13] ss:$0 sm:$0xff] }
 0xbd2   :  { %4361 = vmatmul.mubr.msk.f32.vlgmr.msra.gmra.mrb[14].mxu1 %vm361_vm10, %v1522_v25 }
 0xbd3   :  { %v4696_v26 = vpop.eup %4695  ;;  %4567 = vmatpush3.bf16.msra.mxu1 %v4564_v29  ;;  %v4060_v29 = vld [vmem:[%s5570_s11] ss:$0 sm:$0xff] }
 0xbd4   :  { %v1524_v27 = vmul.f32 %v4696_v26, %v4692_v16  ;;  %4569 = vmatprep.subr.bf16.mxu1 %v4568_v32  ;;  %v1945_v16 = vld [vmem:[%s5573_s14 + $0x28] sm:$0xff] }
 0xbd5   :  { %v4588_v18 = vpack.c.bf16 %v1945_v16, %v1944_v15 }
 0xbd6   :  { %4366 = vmatmul.mubr.msk.f32.vlgmr.msra.gmra.mrb[18].mxu0 %vm361_vm10, %v1524_v27 }
 0xbd7   :  { %4571 = vmatpush3.bf16.msra.mxu1 %v4568_v32  ;;  %4575 = vmatpush3.bf16.msra.mxu0 %v4572_v6  ;;  %v4600_v6 = vpack.c.bf16 %v4074_v5, %v4073_v4 }
 0xbd8   :  { %4577 = vmatprep.subr.bf16.mxu0 %v4576_v9  ;;  %4581 = vmatprep.subr.bf16.mxu1 %v4580_v13 }
 0xbdb   :  { %4579 = vmatpush3.bf16.msra.mxu0 %v4576_v9 }
 0xca5   :  { %v1597_v33 = vpop.f32.mrb[14].mxu1 }
 0xca6   :  { %1695 = vrot.lane.b32.xlu0 %v1597_v33, %s5595_s27  ;;  %v4362_v34 = vpop.f32.mrb[15].mxu1 }
 0xca9   :  { %v1673_v35 = vpop.f32.mrb[18].mxu0 }
 0xcaa   :  { %1697 = vrot.lane.b32.xlu1 %v1673_v35, %s5595_s27  ;;  %v4367_v36 = vpop.f32.mrb[19].mxu0 }
 0xcab   :  { %v1946_v36 = vld [vmem:[%s5573_s14 + $0x30] sm:$0xff] }
 0xcac   :  { %v4592_v38 = vpack.c.bf16 %v1947_v37, %v1946_v36 }
 0xd18   :  { %v1696_v43 = vpop.permute.xlu0 %1695 }
 0xd19   :  { %v1706_v44 = vsel %vm1705_vm11, %v1703_v42, %v1696_v43 }
 0xd1a   :  { %4376 = vmatprep.mubr.msk.f32.mxu1 %vm222_vm8, %v1706_v44 }
 0xd1c   :  { %v1698_v49 = vpop.permute.xlu1 %1697 }
 0xd1d   :  { %v1707_v50 = vsel %vm1705_vm11, %v1704_v48, %v1698_v49  ;;  %v4064_v48 = vld [vmem:[%s5574_s15] ss:$0 sm:$0xff] }
 0xd1e   :  { %4377 = vmatmul.mubr.msk.f32.vlgmr.msra.gmra.mrb[16].mxu1 %vm222_vm8, %v1707_v50 }
 0xd1f   :  { %4583 = vmatpush3.bf16.msra.mxu1 %v4580_v13 }
 0xd20   :  { %4585 = vmatprep.subr.bf16.mxu1 %v4584_v20 }
 0xd23   :  { %4587 = vmatpush3.bf16.msra.mxu1 %v4584_v20 }
 0xd24   :  { %4589 = vmatprep.subr.bf16.mxu1 %v4588_v18 }
 0xd27   :  { %4591 = vmatpush3.bf16.msra.mxu1 %v4588_v18  ;;  %v4070_v18 = vld [vmem:[%s5564_s5 + $0x1] ss:$0 sm:$0xff]  ;;  %s5611_s5 = smov 80  }
 0xd28   :  { %4593 = vmatprep.subr.bf16.mxu1 %v4592_v38 }
 0xd2b   :  { %4595 = vmatpush3.bf16.msra.mxu1 %v4592_v38 }
 0xd2c   :  { %4430 = vmatprep.subr.mxu1 %v4776_v17 }
 0xdf1   :  { %v4378_v51 = vpop.f32.mrb[16].mxu1 }
 0xdf2   :  { %v1797_v52 = vadd.f32 %v4378_v51, %v4056_v55  ;;  %v1791_v53 = vpop.f32.mrb[17].mxu1 }
 0xdf3   :  { %v1792_v54 = vadd.f32 %v4056_v55, %v1791_v53 }
 0xdf4   :  { %v5174_v56 = vadd.f32 %v1797_v52, %v4961_v46 }
 0xdf5   :  { %v5177_v57 = vadd.f32 %v1792_v54, %v4959_v45 }
 0xdf6   :  { %v1807_v58 = vsel %vm222_vm8, %v5174_v56, 0.0 }
 0xdf7   :  { %1808 = vadd.xlane.f32.xlu1 %v1807_v58  ;;  %v1804_v59 = vsel %vm222_vm8, %v5177_v57, 0.0 }
 0xdf8   :  { %1805 = vadd.xlane.f32.xlu0 %v1804_v59 }
 0xe84   :  { %v1809_v60 = vpop.xlane.xlu1 %1808 }
 0xe85   :  { %v1811_v61 = vmul.f32 0.03125, %v1809_v60  ;;  %v1806_v62 = vpop.xlane.xlu0 %1805 }
 0xe86   :  { %v1810_v63 = vmul.f32 0.03125, %v1806_v62 }
 0xe87   :  { %v1813_v0 = vsub.f32 %v5174_v56, %v1811_v61 }
 0xe88   :  { %v1812_v46 = vsub.f32 %v5177_v57, %v1810_v63 }
 0xe89   :  { %v1815_v2 = vmul.f32 %v1813_v0, %v1813_v0 }
 0xe8a   :  { %v1814_v1 = vmul.f32 %v1812_v46, %v1812_v46 }
 0xe8b   :  { %v1819_v3 = vsel %vm222_vm8, %v1815_v2, 0.0  ;;  %v4072_v2 = vld [vmem:[%s5565_s6 + $0x28] sm:$0xff] }
 0xe8c   :  { %v1816_v45 = vsel %vm222_vm8, %v1814_v1, 0.0 }
 0xe8d   :  { %1817 = vadd.xlane.f32.xlu0 %v1816_v45  ;;  %v4071_v45 = vld [vmem:[%s5565_s6 + $0x20] sm:$0xff] }
 0xe91   :  { %1820 = vadd.xlane.f32.xlu0 %v1819_v3  ;;  %v4596_v3 = vpack.c.bf16 %v4072_v2, %v4071_v45 }
 0xe93   :  { %4597 = vmatprep.subr.bf16.mxu0 %v4596_v3 }
 0xf1a   :  { %v1818_v19 = vpop.xlane.xlu0 %1817 }
 0xf1b   :  { %v1822_v21 = vmul.f32 0.03125, %v1818_v19 }
 0xf1d   :  { %v1824_v23 = vadd.f32 1e-06, %v1822_v21 }
 0xf1e   :  { %v1821_v24 = vpop.xlane.xlu0 %1820 }
 0xf1f   :  { %4697 = vrsqrt.f32 %v1824_v23  ;;  %v1823_v25 = vmul.f32 0.03125, %v1821_v24 }
 0xf21   :  { %v1825_v26 = vadd.f32 1e-06, %v1823_v25  ;;  %v4076_v25 = vld [vmem:[%s5566_s7 + $0x1] ss:$0 sm:$0xff]  ;;  %s5612_s7 = smov 112  }
 0xf23   :  { %4699 = vrsqrt.f32 %v1825_v26 }
 0xf29   :  { %v4698_v27 = vpop.eup %4697 }
 0xf2a   :  { %v1828_v28 = vmul.f32 %v4698_v27, %v1812_v46 }
 0xf2c   :  { %v1836_v30 = vmul.f32 %v4059_v22, %v1828_v28 }
 0xf2d   :  { %v4700_v31 = vpop.eup %4699 }
 0xf2e   :  { %v1829_v32 = vmul.f32 %v4700_v31, %v1813_v0  ;;  %v1844_v33 = vadd.f32 %v4060_v29, %v1836_v30 }
 0xf30   :  { %v1837_v34 = vmul.f32 %v4059_v22, %v1829_v32  ;;  %4387 = vmatprep.mubr.msk.f32.mxu0 %vm222_vm8, %v1844_v33 }
 0xf32   :  { %v1845_v35 = vadd.f32 %v4060_v29, %v1837_v34 }
 0xf34   :  { %4388 = vmatmul.mubr.msk.f32.vlgmr.msra.gmra.mrb[20].mxu0 %vm222_vm8, %v1845_v35 }
 0xf35   :  { %4599 = vmatpush3.bf16.msra.mxu0 %v4596_v3 }
 0xf36   :  { %4601 = vmatprep.subr.bf16.mxu0 %v4600_v6 }
 0xf39   :  { %4603 = vmatpush3.bf16.msra.mxu0 %v4600_v6 }
 0xf3a   :  { %4420 = vmatprep.subr.mxu0 %v4776_v17 }
0x1007   :  { %v4389_v40 = vpop.f32.mrb[20].mxu0 }
0x1008   :  { %v1935_v41 = vadd.f32 %v4389_v40, %v4061_v39  ;;  %v1929_v42 = vpop.f32.mrb[21].mxu0 }
0x1009   :  { %v1930_v43 = vadd.f32 %v4061_v39, %v1929_v42 }
0x100a   :  { %v1939_v47 = vmax.f32 %v1935_v41, 0.0 }
0x100b   :  { %v1938_v44 = vmax.f32 %v1930_v43, 0.0 }
0x100d   :  { %4406 = vmatprep.mubr.msk.f32.mxu1 %vm1955_vm12, %v1938_v44 }
0x100e   :  { %4407 = vmatmul.mubr.msk.f32.vlgmr.msra.gmra.mrb[18].mxu1 %vm1955_vm12, %v1939_v47 }
0x100f   :  { %4432 = vmatprep.mubr.msk.f32.mxu1 %vm4777_vm9, %v4776_v17 }
0x10e1   :  { %v4408_v49 = vpop.f32.mrb[18].mxu1 }
0x10e2   :  { %v2034_v50 = vadd.f32 %v4408_v49, %v4064_v48  ;;  %v2028_v55 = vpop.f32.mrb[19].mxu1 }
0x10e3   :  { %v2029_v51 = vadd.f32 %v4064_v48, %v2028_v55 }
0x10e4   :  { %v5243_v52 = vadd.f32 %v2034_v50, %v5174_v56 }
0x10e5   :  { %v5246_v53 = vadd.f32 %v2029_v51, %v5177_v57 }
0x10e6   :  { %v2046_v54 = vsel %vm222_vm8, %v5243_v52, 0.0 }
0x10e7   :  { %2047 = vadd.xlane.f32.xlu1 %v2046_v54  ;;  %v2043_v58 = vsel %vm222_vm8, %v5246_v53, 0.0 }
0x10e8   :  { %2044 = vadd.xlane.f32.xlu0 %v2043_v58 }
0x1174   :  { %v2048_v59 = vpop.xlane.xlu1 %2047 }
0x1175   :  { %v2050_v60 = vmul.f32 0.03125, %v2048_v59  ;;  %v2045_v61 = vpop.xlane.xlu0 %2044 }
0x1176   :  { %v2049_v62 = vmul.f32 0.03125, %v2045_v61 }
0x1177   :  { %v2052_v63 = vsub.f32 %v5243_v52, %v2050_v60 }
0x1178   :  { %v2051_v56 = vsub.f32 %v5246_v53, %v2049_v62 }
0x1179   :  { %v2054_v0 = vmul.f32 %v2052_v63, %v2052_v63 }
0x117a   :  { %v2053_v46 = vmul.f32 %v2051_v56, %v2051_v56 }
0x117b   :  { %v2058_v57 = vsel %vm222_vm8, %v2054_v0, 0.0 }
0x117c   :  { %2059 = vadd.xlane.f32.xlu1 %v2058_v57  ;;  %v2055_v1 = vsel %vm222_vm8, %v2053_v46, 0.0 }
0x117d   :  { %2056 = vadd.xlane.f32.xlu0 %v2055_v1 }
0x1209   :  { %v2060_v7 = vpop.xlane.xlu1 %2059 }
0x120a   :  { %v2062_v8 = vmul.f32 0.03125, %v2060_v7  ;;  %v2057_v9 = vpop.xlane.xlu0 %2056 }
0x120b   :  { %v2061_v10 = vmul.f32 0.03125, %v2057_v9 }
0x120c   :  { %v2064_v11 = vadd.f32 1e-06, %v2062_v8 }
0x120d   :  { %v2063_v12 = vadd.f32 1e-06, %v2061_v10 }
0x120e   :  { %4701 = vrsqrt.f32 %v2064_v11 }
0x120f   :  { %4703 = vrsqrt.f32 %v2063_v12 }
0x1218   :  { %v4702_v13 = vpop.eup %4701 }
0x1219   :  { %v4704_v20 = vpop.eup %4703  ;;  %v2068_v15 = vmul.f32 %v4702_v13, %v2052_v63 }
0x121a   :  { %v2067_v16 = vmul.f32 %v4704_v20, %v2051_v56 }
0x121b   :  { %v2076_v19 = vmul.f32 %v4069_v14, %v2068_v15 }
0x121c   :  { %v2075_v21 = vmul.f32 %v4069_v14, %v2067_v16 }
0x121d   :  { %v2084_v24 = vadd.f32 %v4070_v18, %v2076_v19 }
0x121e   :  { %v2083_v23 = vadd.f32 %v4070_v18, %v2075_v21 }
0x1220   :  { %4417 = vmatprep.mubr.msk.f32.mxu0 %vm222_vm8, %v2083_v23 }
0x1221   :  { %4418 = vmatmul.mubr.msk.f32.vlgmr.msra.gmra.mrb[22].mxu0 %vm222_vm8, %v2084_v24 }
0x1222   :  { %4422 = vmatprep.mubr.msk.f32.mxu0 %vm4777_vm9, %v4776_v17 }
0x12f4   :  { %v4419_v26 = vpop.f32.mrb[22].mxu0 }
0x12f5   :  { %v5282_v27 = vadd.f32 %v4419_v26, %v4076_v25  ;;  %v2170_v22 = vpop.f32.mrb[23].mxu0 }
0x12f6   :  { %v5284_v28 = vadd.f32 %v4076_v25, %v2170_v22 }
0x12f7   :  { %2257 = vrot.lane.b32.xlu1 %v5282_v27, %s4778_s22 }
0x12f8   :  { %2180 = vrot.lane.b32.xlu0 %v5284_v28, %s4778_s22  ;;  %s5613_s22 = smov 48  }
0x1369   :  { %v2258_v30 = vpop.permute.xlu1 %2257 }
0x136a   :  { %v2181_v29 = vpop.permute.xlu0 %2180 }
0x136b   :  { %4421 = vmatpush3.xpose.msk.msra.mxu0 %vm361_vm10, %v2181_v29 }
0x136c   :  { %4425 = vmatprep.subr.mxu0 %v4776_v17 }
0x136e   :  { %4423 = vmatmul.mubr.msk.f32.vlgmr.msra.gmra.mrb[24].mxu0 %vm361_vm10, %v5284_v28 }
0x136f   :  { %4426 = vmatpush3.xpose.msk.msra.mxu0 %vm361_vm10, %v2258_v30  ;;  %4427 = vmatprep.mubr.msk.f32.mxu0 %vm4777_vm9, %v4776_v17 }
0x1370   :  { %4435 = vmatprep.subr.mxu0 %v4776_v17 }
0x1372   :  { %4428 = vmatmul.mubr.msk.f32.vlgmr.msra.gmra.mrb[26].mxu0 %vm361_vm10, %v5282_v27 }
0x1373   :  { %4437 = vmatprep.mubr.msk.f32.mxu0 %vm4777_vm9, %v4776_v17 }
0x1441   :  { %v2252_v31 = vpop.f32.mrb[24].mxu0 }
0x1442   :  { %v4424_v32 = vpop.f32.mrb[25].mxu0  ;;  %v2333_v33 = vsel %vm361_vm10, %v2252_v31, -inf }
0x1443   :  { %2334 = vmax.xlane.f32.xlu1 %v2333_v33 }
0x1445   :  { %v2329_v34 = vpop.f32.mrb[26].mxu0 }
0x1446   :  { %v4429_v35 = vpop.f32.mrb[27].mxu0  ;;  %v2336_v36 = vsel %vm361_vm10, %v2329_v34, -inf }
0x1447   :  { %2337 = vmax.xlane.f32.xlu0 %v2336_v36 }
0x1454   :  { %2431 = vrot.lane.b32.xlu1 %v5282_v27, %s4779_s28 }
0x1458   :  { %2509 = vrot.lane.b32.xlu1 %v5284_v28, %s4780_s4 }
0x145c   :  { %2587 = vrot.lane.b32.xlu1 %v5282_v27, %s4780_s4  ;;  %s5615_s4 = smov 104  }
0x145d   :  { %2355 = vrot.lane.b32.xlu0 %v5284_v28, %s4779_s28  ;;  %s5614_s28 = smov 72  }
0x14d0   :  { %v2335_v37 = vpop.xlane.xlu1 %2334 }
0x14d1   :  { %v2339_v38 = vsub.f32 %v2252_v31, %v2335_v37 }
0x14d3   :  { %v2341_v39 = vmul.f32 1.442695, %v2339_v38 }
0x14d4   :  { %v2432_v40 = vpop.permute.xlu1 %2431  ;;  %v2338_v41 = vpop.xlane.xlu0 %2337 }
0x14d5   :  { %4705 = vpow2.f32 %v2341_v39  ;;  %v2340_v42 = vsub.f32 %v2329_v34, %v2338_v41  ;;  %4436 = vmatpush3.msra.mxu0 %v2432_v40 }
0x14d6   :  { %4445 = vmatprep.subr.mxu0 %v4776_v17 }
0x14d7   :  { %v2343_v43 = vmul.f32 1.442695, %v2340_v42 }
0x14d8   :  { %v2356_v44 = vpop.permute.xlu0 %2355  ;;  %v2510_v55 = vpop.permute.xlu1 %2509 }
0x14d9   :  { %4707 = vpow2.f32 %v2343_v43  ;;  %4431 = vmatpush3.msra.mxu1 %v2356_v44 }
0x14da   :  { %4440 = vmatprep.subr.mxu1 %v4776_v17 }
0x14dc   :  { %v2588_v51 = vpop.permute.xlu1 %2587 }
0x14df   :  { %v4706_v47 = vpop.eup %4705 }
0x14e0   :  { %v2345_v48 = vsel %vm361_vm10, %v4706_v47, 0.0 }
0x14e1   :  { %2346 = vadd.xlane.f32.xlu0 %v2345_v48 }
0x14e3   :  { %v4708_v49 = vpop.eup %4707 }
0x14e4   :  { %v2348_v50 = vsel %vm361_vm10, %v4708_v49, 0.0 }
0x14e5   :  { %2349 = vadd.xlane.f32.xlu1 %v2348_v50 }
0x14f6   :  { %2585 = vrot.lane.b32.xlu1 %v5282_v27, %s4781_s29 }
0x14f7   :  { %2507 = vrot.lane.b32.xlu0 %v5284_v28, %s4781_s29  ;;  %s5616_s29 = smov 40  }
0x156e   :  { %v2347_v54 = vpop.xlane.xlu0 %2346 }
0x156f   :  { %4709 = vrcp.f32 %v2347_v54 }
0x1572   :  { %v2350_v58 = vpop.xlane.xlu1 %2349  ;;  %v2508_v63 = vpop.permute.xlu0 %2507 }
0x1573   :  { %4711 = vrcp.f32 %v2350_v58 }
0x1576   :  { %v2586_v56 = vpop.permute.xlu1 %2585 }
0x1579   :  { %v4710_v59 = vpop.eup %4709 }
0x157a   :  { %v2352_v60 = vmul.f32 %v4710_v59, %v4706_v47 }
0x157c   :  { %4433 = vmatmul.mubr.msk.f32.vlgmr.msra.gmra.mrb[20].mxu1 %vm361_vm10, %v2352_v60 }
0x157d   :  { %v4712_v61 = vpop.eup %4711  ;;  %4441 = vmatpush3.xpose.msk.msra.mxu1 %vm361_vm10, %v2510_v55  ;;  %4442 = vmatprep.mubr.msk.f32.mxu1 %vm4777_vm9, %v4776_v17 }
0x157e   :  { %v2354_v62 = vmul.f32 %v4712_v61, %v4708_v49  ;;  %4450 = vmatprep.subr.mxu1 %v4776_v17 }
0x1580   :  { %4438 = vmatmul.mubr.msk.f32.vlgmr.msra.gmra.mrb[28].mxu0 %vm361_vm10, %v2354_v62  ;;  %4443 = vmatmul.mubr.msk.f32.vlgmr.msra.gmra.mrb[22].mxu1 %vm361_vm10, %v2508_v63 }
0x1581   :  { %4446 = vmatpush3.xpose.msk.msra.mxu0 %vm361_vm10, %v2588_v51  ;;  %4447 = vmatprep.mubr.msk.f32.mxu0 %vm4777_vm9, %v4776_v17 }
0x1582   :  { %4455 = vmatprep.subr.mxu0 %v4776_v17  ;;  %4452 = vmatprep.mubr.msk.f32.mxu1 %vm4777_vm9, %v4776_v17 }
0x1584   :  { %4448 = vmatmul.mubr.msk.f32.vlgmr.msra.gmra.mrb[30].mxu0 %vm361_vm10, %v2586_v56 }
0x1585   :  { %4457 = vmatprep.mubr.msk.f32.mxu0 %vm4777_vm9, %v4776_v17 }
0x164f   :  { %v5336_v0 = vpop.f32.mrb[20].mxu1 }
0x1650   :  { %v4434_v46 = vpop.f32.mrb[21].mxu1 }
0x1653   :  { %v5338_v57 = vpop.f32.mrb[28].mxu0  ;;  %v2581_v1 = vpop.f32.mrb[22].mxu1 }
0x1654   :  { %v4439_v45 = vpop.f32.mrb[29].mxu0  ;;  %v4444_v2 = vpop.f32.mrb[23].mxu1  ;;  %v2663_v3 = vsel %vm361_vm10, %v2581_v1, -inf }
0x1655   :  { %2664 = vmax.xlane.f32.xlu0 %v2663_v3 }
0x1657   :  { %v2659_v4 = vpop.f32.mrb[30].mxu0 }
0x1658   :  { %v4449_v5 = vpop.f32.mrb[31].mxu0  ;;  %v2666_v6 = vsel %vm361_vm10, %v2659_v4, -inf }
0x1659   :  { %2667 = vmax.xlane.f32.xlu1 %v2666_v6 }
0x166a   :  { %2761 = vrot.lane.b32.xlu1 %v5282_v27, %s4782_s30 }
0x166b   :  { %2685 = vrot.lane.b32.xlu0 %v5284_v28, %s4782_s30  ;;  %s5617_s30 = smov 8  }
0x166e   :  { %2839 = vrot.lane.b32.xlu1 %v5284_v28, %s5611_s5 }
0x1672   :  { %2917 = vrot.lane.b32.xlu1 %v5282_v27, %s5611_s5 }
0x1676   :  { %2915 = vrot.lane.b32.xlu1 %v5282_v27, %s5612_s7 }
0x16e2   :  { %v2665_v7 = vpop.xlane.xlu0 %2664 }
0x16e3   :  { %v2669_v8 = vsub.f32 %v2581_v1, %v2665_v7 }
0x16e5   :  { %v2671_v9 = vmul.f32 1.442695, %v2669_v8 }
0x16e6   :  { %v2686_v10 = vpop.permute.xlu0 %2685  ;;  %v2668_v11 = vpop.xlane.xlu1 %2667 }
0x16e7   :  { %4713 = vpow2.f32 %v2671_v9  ;;  %v2670_v12 = vsub.f32 %v2659_v4, %v2668_v11  ;;  %4451 = vmatpush3.msra.mxu1 %v2686_v10 }
0x16e8   :  { %4460 = vmatprep.subr.mxu1 %v4776_v17 }
0x16e9   :  { %v2673_v13 = vmul.f32 1.442695, %v2670_v12 }
0x16ea   :  { %v2762_v14 = vpop.permute.xlu1 %2761 }
0x16eb   :  { %4715 = vpow2.f32 %v2673_v13  ;;  %4456 = vmatpush3.msra.mxu0 %v2762_v14 }
0x16ec   :  { %4465 = vmatprep.subr.mxu0 %v4776_v17 }
0x16ee   :  { %v2840_v23 = vpop.permute.xlu1 %2839 }
0x16f1   :  { %v4714_v20 = vpop.eup %4713 }
0x16f2   :  { %v2675_v15 = vsel %vm361_vm10, %v4714_v20, 0.0  ;;  %v2918_v22 = vpop.permute.xlu1 %2917 }
0x16f3   :  { %2676 = vadd.xlane.f32.xlu0 %v2675_v15 }
0x16f5   :  { %v4716_v16 = vpop.eup %4715 }
0x16f6   :  { %v2678_v18 = vsel %vm361_vm10, %v4716_v16, 0.0  ;;  %v2916_v31 = vpop.permute.xlu1 %2915 }
0x16f7   :  { %2679 = vadd.xlane.f32.xlu0 %v2678_v18 }
0x170d   :  { %2837 = vrot.lane.b32.xlu0 %v5284_v28, %s5612_s7 }
0x1780   :  { %v2677_v19 = vpop.xlane.xlu0 %2676 }
0x1781   :  { %4717 = vrcp.f32 %v2677_v19 }
0x1784   :  { %v2680_v21 = vpop.xlane.xlu0 %2679 }
0x1785   :  { %4719 = vrcp.f32 %v2680_v21 }
0x1788   :  { %v2838_v30 = vpop.permute.xlu0 %2837 }
0x178b   :  { %v4718_v24 = vpop.eup %4717 }
0x178c   :  { %v2682_v25 = vmul.f32 %v4718_v24, %v4714_v20 }
0x178e   :  { %4453 = vmatmul.mubr.msk.f32.vlgmr.msra.gmra.mrb[24].mxu1 %vm361_vm10, %v2682_v25 }
0x178f   :  { %v4720_v26 = vpop.eup %4719  ;;  %4461 = vmatpush3.xpose.msk.msra.mxu1 %vm361_vm10, %v2840_v23  ;;  %4462 = vmatprep.mubr.msk.f32.mxu1 %vm4777_vm9, %v4776_v17 }
0x1790   :  { %v2684_v29 = vmul.f32 %v4720_v26, %v4716_v16  ;;  %4470 = vmatprep.subr.mxu1 %v4776_v17 }
0x1792   :  { %4458 = vmatmul.mubr.msk.f32.vlgmr.msra.gmra.mrb[32].mxu0 %vm361_vm10, %v2684_v29  ;;  %4463 = vmatmul.mubr.msk.f32.vlgmr.msra.gmra.mrb[26].mxu1 %vm361_vm10, %v2838_v30 }
0x1793   :  { %4466 = vmatpush3.xpose.msk.msra.mxu0 %vm361_vm10, %v2918_v22  ;;  %4467 = vmatprep.mubr.msk.f32.mxu0 %vm4777_vm9, %v4776_v17 }
0x1794   :  { %4475 = vmatprep.subr.mxu0 %v4776_v17  ;;  %4472 = vmatprep.mubr.msk.f32.mxu1 %vm4777_vm9, %v4776_v17 }
0x1796   :  { %4468 = vmatmul.mubr.msk.f32.vlgmr.msra.gmra.mrb[34].mxu0 %vm361_vm10, %v2916_v31 }
0x1797   :  { %4477 = vmatprep.mubr.msk.f32.mxu0 %vm4777_vm9, %v4776_v17 }
0x1861   :  { %v5374_v32 = vpop.f32.mrb[24].mxu1 }
0x1862   :  { %v4454_v33 = vpop.f32.mrb[25].mxu1 }
0x1863   :  { %v4104_v33 = vld [vmem:[%s5567_s8 + $0x28] sm:$0xff] }
0x1865   :  { %v5376_v34 = vpop.f32.mrb[32].mxu0  ;;  %v2911_v35 = vpop.f32.mrb[26].mxu1 }
0x1866   :  { %v4459_v36 = vpop.f32.mrb[33].mxu0  ;;  %v4464_v37 = vpop.f32.mrb[27].mxu1  ;;  %v2993_v38 = vsel %vm361_vm10, %v2911_v35, -inf }
0x1867   :  { %2994 = vmax.xlane.f32.xlu0 %v2993_v38  ;;  %v4106_v36 = vld [vmem:[%s5567_s8 + $0x38] sm:$0xff] }
0x1869   :  { %v2989_v39 = vpop.f32.mrb[34].mxu0 }
0x186a   :  { %v4469_v40 = vpop.f32.mrb[35].mxu0  ;;  %v2996_v41 = vsel %vm361_vm10, %v2989_v39, -inf }
0x186b   :  { %2997 = vmax.xlane.f32.xlu1 %v2996_v41 }
0x187c   :  { %3091 = vrot.lane.b32.xlu1 %v5282_v27, %s5613_s22 }
0x187d   :  { %3015 = vrot.lane.b32.xlu0 %v5284_v28, %s5613_s22 }
0x1880   :  { %3169 = vrot.lane.b32.xlu1 %v5284_v28, %s5614_s28 }
0x1884   :  { %3247 = vrot.lane.b32.xlu1 %v5282_v27, %s5614_s28 }
0x1888   :  { %3245 = vrot.lane.b32.xlu1 %v5282_v27, %s5615_s4 }
0x18f4   :  { %v2995_v42 = vpop.xlane.xlu0 %2994 }
0x18f5   :  { %v2999_v43 = vsub.f32 %v2911_v35, %v2995_v42  ;;  %v4105_v35 = vld [vmem:[%s5567_s8 + $0x30] sm:$0xff] }
0x18f6   :  { %v4608_v37 = vpack.c.bf16 %v4106_v36, %v4105_v35 }
0x18f7   :  { %v3001_v44 = vmul.f32 1.442695, %v2999_v43 }
0x18f8   :  { %v3016_v47 = vpop.permute.xlu0 %3015  ;;  %v2998_v48 = vpop.xlane.xlu1 %2997 }
0x18f9   :  { %4721 = vpow2.f32 %v3001_v44  ;;  %v3000_v49 = vsub.f32 %v2989_v39, %v2998_v48  ;;  %4471 = vmatpush3.msra.mxu1 %v3016_v47 }
0x18fa   :  { %4480 = vmatprep.subr.mxu1 %v4776_v17 }
0x18fb   :  { %v3003_v50 = vmul.f32 1.442695, %v3000_v49 }
0x18fc   :  { %v3092_v55 = vpop.permute.xlu1 %3091 }
0x18fd   :  { %4723 = vpow2.f32 %v3003_v50  ;;  %4476 = vmatpush3.msra.mxu0 %v3092_v55 }
0x18fe   :  { %4485 = vmatprep.subr.mxu0 %v4776_v17 }
0x1900   :  { %v3170_v62 = vpop.permute.xlu1 %3169 }
0x1903   :  { %v4722_v51 = vpop.eup %4721 }
0x1904   :  { %v3005_v54 = vsel %vm361_vm10, %v4722_v51, 0.0  ;;  %v3248_v1 = vpop.permute.xlu1 %3247 }
0x1905   :  { %3006 = vadd.xlane.f32.xlu0 %v3005_v54 }
0x1907   :  { %v4724_v58 = vpop.eup %4723 }
0x1908   :  { %v3008_v59 = vsel %vm361_vm10, %v4724_v58, 0.0  ;;  %v3246_v3 = vpop.permute.xlu1 %3245 }
0x1909   :  { %3009 = vadd.xlane.f32.xlu0 %v3008_v59 }
0x191f   :  { %3167 = vrot.lane.b32.xlu0 %v5284_v28, %s5615_s4 }
0x1992   :  { %v3007_v60 = vpop.xlane.xlu0 %3006 }
0x1993   :  { %4725 = vrcp.f32 %v3007_v60 }
0x1996   :  { %v3010_v61 = vpop.xlane.xlu0 %3009 }
0x1997   :  { %4727 = vrcp.f32 %v3010_v61 }
0x199a   :  { %v3168_v2 = vpop.permute.xlu0 %3167 }
0x199d   :  { %v4726_v63 = vpop.eup %4725 }
0x199e   :  { %v3012_v56 = vmul.f32 %v4726_v63, %v4722_v51 }
0x19a0   :  { %4473 = vmatmul.mubr.msk.f32.vlgmr.msra.gmra.mrb[28].mxu1 %vm361_vm10, %v3012_v56 }
0x19a1   :  { %v4728_v46 = vpop.eup %4727  ;;  %4481 = vmatpush3.xpose.msk.msra.mxu1 %vm361_vm10, %v3170_v62  ;;  %4482 = vmatprep.mubr.msk.f32.mxu1 %vm4777_vm9, %v4776_v17 }
0x19a2   :  { %v3014_v45 = vmul.f32 %v4728_v46, %v4724_v58  ;;  %4490 = vmatprep.subr.mxu1 %v4776_v17 }
0x19a4   :  { %4478 = vmatmul.mubr.msk.f32.vlgmr.msra.gmra.mrb[36].mxu0 %vm361_vm10, %v3014_v45  ;;  %4483 = vmatmul.mubr.msk.f32.vlgmr.msra.gmra.mrb[30].mxu1 %vm361_vm10, %v3168_v2 }
0x19a5   :  { %4486 = vmatpush3.xpose.msk.msra.mxu0 %vm361_vm10, %v3248_v1  ;;  %4487 = vmatprep.mubr.msk.f32.mxu0 %vm4777_vm9, %v4776_v17 }
0x19a6   :  { %4495 = vmatprep.subr.mxu0 %v4776_v17  ;;  %4492 = vmatprep.mubr.msk.f32.mxu1 %vm4777_vm9, %v4776_v17 }
0x19a8   :  { %4488 = vmatmul.mubr.msk.f32.vlgmr.msra.gmra.mrb[38].mxu0 %vm361_vm10, %v3246_v3 }
0x19a9   :  { %4497 = vmatprep.mubr.msk.f32.mxu0 %vm4777_vm9, %v4776_v17 }
0x1a73   :  { %v3087_v4 = vpop.f32.mrb[28].mxu1 }
0x1a74   :  { %v4474_v5 = vpop.f32.mrb[29].mxu1 }
0x1a77   :  { %v3163_v6 = vpop.f32.mrb[36].mxu0  ;;  %v3241_v7 = vpop.f32.mrb[30].mxu1 }
0x1a78   :  { %v4479_v8 = vpop.f32.mrb[37].mxu0  ;;  %v4484_v9 = vpop.f32.mrb[31].mxu1  ;;  %v3323_v10 = vsel %vm361_vm10, %v3241_v7, -inf }
0x1a79   :  { %3324 = vmax.xlane.f32.xlu0 %v3323_v10  ;;  %v4115_v9 = vld [vmem:[%s5571_s12 + $0x20] sm:$0xff]  ;;  %v4116_v10 = vld [vmem:[%s5571_s12 + $0x28] sm:$0xff] }
0x1a7b   :  { %v3319_v11 = vpop.f32.mrb[38].mxu0 }
0x1a7c   :  { %v4489_v12 = vpop.f32.mrb[39].mxu0  ;;  %v3326_v13 = vsel %vm361_vm10, %v3319_v11, -inf }
0x1a7d   :  { %3327 = vmax.xlane.f32.xlu1 %v3326_v13  ;;  %v4117_v12 = vld [vmem:[%s5571_s12 + $0x30] sm:$0xff]  ;;  %v4118_v13 = vld [vmem:[%s5571_s12 + $0x38] sm:$0xff] }
0x1a8e   :  { %3421 = vrot.lane.b32.xlu1 %v5282_v27, %s5616_s29 }
0x1a92   :  { %3499 = vrot.lane.b32.xlu1 %v5374_v32, %s5617_s30 }
0x1a96   :  { %3501 = vrot.lane.b32.xlu1 %v5376_v34, %s5617_s30 }
0x1a9a   :  { %3509 = vrot.lane.b32.xlu1 %v3163_v6, %s5618_s19 }
0x1b06   :  { %v3325_v17 = vpop.xlane.xlu0 %3324 }
0x1b07   :  { %v3329_v14 = vsub.f32 %v3241_v7, %v3325_v17  ;;  %v4616_v17 = vpack.c.bf16 %v4118_v13, %v4117_v12 }
0x1b09   :  { %v3331_v20 = vmul.f32 1.442695, %v3329_v14  ;;  %v4123_v14 = vld [vmem:[%s5573_s14 + $0x40] sm:$0xff] }
0x1b0a   :  { %v3328_v15 = vpop.xlane.xlu1 %3327 }
0x1b0b   :  { %4729 = vpow2.f32 %v3331_v20  ;;  %v3330_v16 = vsub.f32 %v3319_v11, %v3328_v15  ;;  %v4612_v11 = vpack.c.bf16 %v4116_v10, %v4115_v9  ;;  %v4124_v20 = vld [vmem:[%s5573_s14 + $0x48] sm:$0xff]  ;;  %v4125_v15 = vld [vmem:[%s5573_s14 + $0x50] sm:$0xff]  ;;  %v3912_v9 = vld [vmem:[%s5577_s18 + $0x18] sm:$0xff] }
0x1b0d   :  { %v3333_v18 = vmul.f32 1.442695, %v3330_v16  ;;  %v4620_v16 = vpack.c.bf16 %v4124_v20, %v4123_v14 }
0x1b0e   :  { %v3422_v19 = vpop.permute.xlu1 %3421 }
0x1b0f   :  { %4731 = vpow2.f32 %v3333_v18  ;;  %4496 = vmatpush3.msra.mxu0 %v3422_v19  ;;  %v4126_v18 = vld [vmem:[%s5573_s14 + $0x58] sm:$0xff] }
0x1b10   :  { %4613 = vmatprep.subr.bf16.mxu0 %v4612_v11  ;;  %v4624_v19 = vpack.c.bf16 %v4126_v18, %v4125_v15 }
0x1b12   :  { %v3500_v42 = vpop.permute.xlu1 %3499 }
0x1b13   :  { %v3521_v47 = vsel %vm361_vm10, %v5336_v0, %v3500_v42  ;;  %v4108_v0 = vld [vmem:[%s5568_s9 + $0x1] ss:$0 sm:$0xff] }
0x1b15   :  { %v4730_v21 = vpop.eup %4729 }
0x1b16   :  { %v3335_v27 = vsel %vm361_vm10, %v4730_v21, 0.0  ;;  %v3502_v43 = vpop.permute.xlu1 %3501 }
0x1b17   :  { %3336 = vadd.xlane.f32.xlu0 %v3335_v27  ;;  %v3522_v51 = vsel %vm361_vm10, %v5338_v57, %v3502_v43  ;;  %v4128_v27 = vld [vmem:[%s5573_s14 + $0x68] sm:$0xff]  ;;  %v4120_v43 = vld [vmem:[%s5572_s13 + $0x1] ss:$0 sm:$0xff] }
0x1b19   :  { %v4732_v23 = vpop.eup %4731 }
0x1b1a   :  { %v3338_v24 = vsel %vm361_vm10, %v4732_v23, 0.0  ;;  %v3510_v48 = vpop.permute.xlu1 %3509 }
0x1b1b   :  { %3339 = vadd.xlane.f32.xlu0 %v3338_v24  ;;  %v3524_v54 = vsel %vm137_vm7, %v3522_v51, %v3510_v48  ;;  %v4132_v51 = vld [vmem:[%s5574_s15 + $0x1] ss:$0 sm:$0xff] }
0x1b31   :  { %3345 = vrot.lane.b32.xlu0 %v5284_v28, %s5616_s29  ;;  %v4103_v28 = vld [vmem:[%s5567_s8 + $0x20] sm:$0xff] }
0x1b32   :  { %v4604_v34 = vpack.c.bf16 %v4104_v33, %v4103_v28  ;;  %v4114_v33 = vld [vmem:[%s5570_s11 + $0x1] ss:$0 sm:$0xff] }
0x1b35   :  { %3507 = vrot.lane.b32.xlu0 %v3087_v4, %s5618_s19 }
0x1ba4   :  { %v3337_v25 = vpop.xlane.xlu0 %3336 }
0x1ba5   :  { %4733 = vrcp.f32 %v3337_v25 }
0x1ba8   :  { %v3340_v26 = vpop.xlane.xlu0 %3339 }
0x1ba9   :  { %4735 = vrcp.f32 %v3340_v26 }
0x1bac   :  { %v3346_v22 = vpop.permute.xlu0 %3345 }
0x1bad   :  { %4491 = vmatpush3.msra.mxu1 %v3346_v22 }
0x1bae   :  { %4605 = vmatprep.subr.bf16.mxu1 %v4604_v34 }
0x1baf   :  { %v4734_v29 = vpop.eup %4733 }
0x1bb0   :  { %v3342_v30 = vmul.f32 %v4734_v29, %v4730_v21  ;;  %v3508_v44 = vpop.permute.xlu0 %3507  ;;  %v4127_v21 = vld [vmem:[%s5573_s14 + $0x60] sm:$0xff] }
0x1bb1   :  { %v3523_v49 = vsel %vm137_vm7, %v3521_v47, %v3508_v44 }
0x1bb2   :  { %4493 = vmatmul.mubr.msk.f32.vlgmr.msra.gmra.mrb[32].mxu1 %vm361_vm10, %v3342_v30 }
0x1bb3   :  { %v4736_v31 = vpop.eup %4735  ;;  %4607 = vmatpush3.bf16.msra.mxu1 %v4604_v34 }
0x1bb4   :  { %v3344_v32 = vmul.f32 %v4736_v31, %v4732_v23  ;;  %4609 = vmatprep.subr.bf16.mxu1 %v4608_v37  ;;  %v4628_v23 = vpack.c.bf16 %v4128_v27, %v4127_v21  ;;  %v4136_v27 = vld [vmem:[%s5576_s17] ss:$0 sm:$0xff] }
0x1bb6   :  { %4498 = vmatmul.mubr.msk.f32.vlgmr.msra.gmra.mrb[40].mxu0 %vm361_vm10, %v3344_v32  ;;  %v4113_v32 = vld [vmem:[%s5569_s10 + $0x1] ss:$0 sm:$0xff] }
0x1bb7   :  { %4611 = vmatpush3.bf16.msra.mxu1 %v4608_v37  ;;  %4615 = vmatpush3.bf16.msra.mxu0 %v4612_v11 }
0x1bb8   :  { %4617 = vmatprep.subr.bf16.mxu0 %v4616_v17  ;;  %4621 = vmatprep.subr.bf16.mxu1 %v4620_v16 }
0x1bbb   :  { %4619 = vmatpush3.bf16.msra.mxu0 %v4616_v17 }
0x1c85   :  { %v3417_v38 = vpop.f32.mrb[32].mxu1 }
0x1c86   :  { %3515 = vrot.lane.b32.xlu0 %v3417_v38, %s5619_s3  ;;  %v4494_v39 = vpop.f32.mrb[33].mxu1 }
0x1c89   :  { %v3493_v40 = vpop.f32.mrb[40].mxu0 }
0x1c8a   :  { %3517 = vrot.lane.b32.xlu1 %v3493_v40, %s5619_s3  ;;  %v4499_v41 = vpop.f32.mrb[41].mxu0  ;;  %v4129_v40 = vld [vmem:[%s5573_s14 + $0x70] sm:$0xff] }
0x1c8b   :  { %v4130_v41 = vld [vmem:[%s5573_s14 + $0x78] sm:$0xff] }
0x1c8c   :  { %v4632_v42 = vpack.c.bf16 %v4130_v41, %v4129_v40 }
0x1cf8   :  { %v3516_v50 = vpop.permute.xlu0 %3515 }
0x1cf9   :  { %v3525_v55 = vsel %vm1705_vm11, %v3523_v49, %v3516_v50 }
0x1cfa   :  { %4508 = vmatprep.mubr.msk.f32.mxu1 %vm222_vm8, %v3525_v55 }
0x1cfc   :  { %v3518_v58 = vpop.permute.xlu1 %3517 }
0x1cfd   :  { %v3526_v59 = vsel %vm1705_vm11, %v3524_v54, %v3518_v58 }
0x1cfe   :  { %4509 = vmatmul.mubr.msk.f32.vlgmr.msra.gmra.mrb[34].mxu1 %vm222_vm8, %v3526_v59 }
0x1cff   :  { %4623 = vmatpush3.bf16.msra.mxu1 %v4620_v16  ;;  %v4135_v16 = vld [vmem:[%s5575_s16] ss:$0 sm:$0xff] }
0x1d00   :  { %4625 = vmatprep.subr.bf16.mxu1 %v4624_v19 }
0x1d03   :  { %4627 = vmatpush3.bf16.msra.mxu1 %v4624_v19 }
0x1d04   :  { %4629 = vmatprep.subr.bf16.mxu1 %v4628_v23 }
0x1d07   :  { %4631 = vmatpush3.bf16.msra.mxu1 %v4628_v23 }
0x1d08   :  { %4633 = vmatprep.subr.bf16.mxu1 %v4632_v42 }
0x1d0b   :  { %4635 = vmatpush3.bf16.msra.mxu1 %v4632_v42 }
0x1dd1   :  { %v4510_v60 = vpop.f32.mrb[34].mxu1 }
0x1dd2   :  { %v3618_v61 = vadd.f32 %v4510_v60, %v4108_v0  ;;  %v3612_v62 = vpop.f32.mrb[35].mxu1 }
0x1dd3   :  { %v3613_v63 = vadd.f32 %v4108_v0, %v3612_v62 }
0x1dd4   :  { %v5456_v56 = vadd.f32 %v3618_v61, %v5243_v52 }
0x1dd5   :  { %v5459_v57 = vadd.f32 %v3613_v63, %v5246_v53 }
0x1dd6   :  { %v3630_v46 = vsel %vm222_vm8, %v5456_v56, 0.0 }
0x1dd7   :  { %3631 = vadd.xlane.f32.xlu1 %v3630_v46  ;;  %v3627_v1 = vsel %vm222_vm8, %v5459_v57, 0.0 }
0x1dd8   :  { %3628 = vadd.xlane.f32.xlu0 %v3627_v1 }
0x1e64   :  { %v3632_v45 = vpop.xlane.xlu1 %3631 }
0x1e65   :  { %v3634_v2 = vmul.f32 0.03125, %v3632_v45  ;;  %v3629_v3 = vpop.xlane.xlu0 %3628 }
0x1e66   :  { %v3633_v4 = vmul.f32 0.03125, %v3629_v3 }
0x1e67   :  { %v3636_v5 = vsub.f32 %v5456_v56, %v3634_v2 }
0x1e68   :  { %v3635_v52 = vsub.f32 %v5459_v57, %v3633_v4 }
0x1e69   :  { %v3638_v7 = vmul.f32 %v3636_v5, %v3636_v5 }
0x1e6a   :  { %v3637_v6 = vmul.f32 %v3635_v52, %v3635_v52 }
0x1e6b   :  { %v3642_v8 = vsel %vm222_vm8, %v3638_v7, 0.0 }
0x1e6c   :  { %v3639_v53 = vsel %vm222_vm8, %v3637_v6, 0.0 }
0x1e6d   :  { %3640 = vadd.xlane.f32.xlu0 %v3639_v53  ;;  %v3910_v53 = vld [vmem:[%s5577_s18 + $0x8] sm:$0xff] }
0x1e71   :  { %3643 = vadd.xlane.f32.xlu0 %v3642_v8  ;;  %v3911_v8 = vld [vmem:[%s5577_s18 + $0x10] sm:$0xff] }
0x1e72   :  { %v4640_v10 = vpack.c.bf16 %v3912_v9, %v3911_v8 }
0x1efa   :  { %v3641_v24 = vpop.xlane.xlu0 %3640 }
0x1efb   :  { %v3645_v25 = vmul.f32 0.03125, %v3641_v24 }
0x1efd   :  { %v3647_v26 = vadd.f32 1e-06, %v3645_v25 }
0x1efe   :  { %v3644_v22 = vpop.xlane.xlu0 %3643 }
0x1eff   :  { %4737 = vrsqrt.f32 %v3647_v26  ;;  %v3646_v29 = vmul.f32 0.03125, %v3644_v22  ;;  %v4137_v22 = vld [vmem:[#allocation2] ss:$0 sm:$0xff] }
0x1f01   :  { %v3648_v30 = vadd.f32 1e-06, %v3646_v29 }
0x1f03   :  { %4739 = vrsqrt.f32 %v3648_v30 }
0x1f09   :  { %v4738_v31 = vpop.eup %4737 }
0x1f0a   :  { %v3651_v28 = vmul.f32 %v4738_v31, %v3635_v52 }
0x1f0c   :  { %v3659_v34 = vmul.f32 %v4113_v32, %v3651_v28 }
0x1f0d   :  { %v4740_v35 = vpop.eup %4739 }
0x1f0e   :  { %v3652_v36 = vmul.f32 %v4740_v35, %v3636_v5  ;;  %v3667_v37 = vadd.f32 %v4114_v33, %v3659_v34 }
0x1f10   :  { %v3660_v38 = vmul.f32 %v4113_v32, %v3652_v36  ;;  %4519 = vmatprep.mubr.msk.f32.mxu0 %vm222_vm8, %v3667_v37 }
0x1f12   :  { %v3668_v39 = vadd.f32 %v4114_v33, %v3660_v38 }
0x1f14   :  { %4520 = vmatmul.mubr.msk.f32.vlgmr.msra.gmra.mrb[42].mxu0 %vm222_vm8, %v3668_v39 }
0x1fe7   :  { %v4521_v44 = vpop.f32.mrb[42].mxu0 }
0x1fe8   :  { %v3760_v47 = vadd.f32 %v4521_v44, %v4120_v43  ;;  %v3754_v48 = vpop.f32.mrb[43].mxu0 }
0x1fe9   :  { %v3755_v49 = vadd.f32 %v4120_v43, %v3754_v48 }
0x1fea   :  { %v3764_v55 = vmax.f32 %v3760_v47, 0.0 }
0x1feb   :  { %v3763_v50 = vmax.f32 %v3755_v49, 0.0 }
0x1fed   :  { %4538 = vmatprep.mubr.msk.f32.mxu1 %vm1955_vm12, %v3763_v50 }
0x1fee   :  { %4539 = vmatmul.mubr.msk.f32.vlgmr.msra.gmra.mrb[36].mxu1 %vm1955_vm12, %v3764_v55 }
0x20c1   :  { %v4540_v54 = vpop.f32.mrb[36].mxu1 }
0x20c2   :  { %v3860_v58 = vadd.f32 %v4540_v54, %v4132_v51  ;;  %v3854_v59 = vpop.f32.mrb[37].mxu1 }
0x20c3   :  { %v3855_v0 = vadd.f32 %v4132_v51, %v3854_v59 }
0x20c4   :  { %v3864_v60 = vadd.f32 %v3860_v58, %v5456_v56 }
0x20c5   :  { %v3863_v61 = vadd.f32 %v3855_v0, %v5459_v57  ;;  %v3909_v57 = vld [vmem:[%s5577_s18] sm:$0xff] }
0x20c6   :  { %v3870_v62 = vsel %vm222_vm8, %v3864_v60, 0.0  ;;  %v4636_v7 = vpack.c.bf16 %v3910_v53, %v3909_v57 }
0x20c7   :  { %3871 = vadd.xlane.f32.xlu1 %v3870_v62  ;;  %v3867_v63 = vsel %vm222_vm8, %v3863_v61, 0.0 }
0x20c8   :  { %3868 = vadd.xlane.f32.xlu0 %v3867_v63  ;;  %4637 = vmatprep.subr.bf16.mxu0 %v4636_v7 }
0x20c9   :  { %4639 = vmatpush3.bf16.msra.mxu0 %v4636_v7 }
0x20ca   :  { %4641 = vmatprep.subr.bf16.mxu0 %v4640_v10 }
0x20cd   :  { %4643 = vmatpush3.bf16.msra.mxu0 %v4640_v10 }
0x2154   :  { %v3872_v46 = vpop.xlane.xlu1 %3871 }
0x2155   :  { %v3874_v1 = vmul.f32 0.03125, %v3872_v46  ;;  %v3869_v45 = vpop.xlane.xlu0 %3868 }
0x2156   :  { %v3873_v2 = vmul.f32 0.03125, %v3869_v45 }
0x2157   :  { %v3876_v3 = vsub.f32 %v3864_v60, %v3874_v1 }
0x2158   :  { %v3875_v4 = vsub.f32 %v3863_v61, %v3873_v2 }
0x2159   :  { %v3878_v5 = vmul.f32 %v3876_v3, %v3876_v3 }
0x215a   :  { %v3877_v52 = vmul.f32 %v3875_v4, %v3875_v4 }
0x215b   :  { %v3882_v6 = vsel %vm222_vm8, %v3878_v5, 0.0 }
0x215c   :  { %3883 = vadd.xlane.f32.xlu1 %v3882_v6  ;;  %v3879_v56 = vsel %vm222_vm8, %v3877_v52, 0.0 }
0x215d   :  { %3880 = vadd.xlane.f32.xlu0 %v3879_v56 }
0x21e9   :  { %v3884_v11 = vpop.xlane.xlu1 %3883 }
0x21ea   :  { %v3886_v12 = vmul.f32 0.03125, %v3884_v11  ;;  %v3881_v13 = vpop.xlane.xlu0 %3880 }
0x21eb   :  { %v3885_v17 = vmul.f32 0.03125, %v3881_v13 }
0x21ec   :  { %v3888_v14 = vadd.f32 1e-06, %v3886_v12 }
0x21ed   :  { %v3887_v20 = vadd.f32 1e-06, %v3885_v17 }
0x21ee   :  { %4741 = vrsqrt.f32 %v3888_v14 }
0x21ef   :  { %4743 = vrsqrt.f32 %v3887_v20 }
0x21f8   :  { %v4742_v15 = vpop.eup %4741 }
0x21f9   :  { %v4744_v18 = vpop.eup %4743  ;;  %v3892_v19 = vmul.f32 %v4742_v15, %v3876_v3 }
0x21fa   :  { %v3891_v21 = vmul.f32 %v4744_v18, %v3875_v4 }
0x21fb   :  { %v3900_v23 = vmul.f32 %v4135_v16, %v3892_v19 }
0x21fc   :  { %v3899_v24 = vmul.f32 %v4135_v16, %v3891_v21 }
0x21fd   :  { %v3908_v26 = vadd.f32 %v4136_v27, %v3900_v23 }
0x21fe   :  { %v3907_v25 = vadd.f32 %v4136_v27, %v3899_v24 }
0x2200   :  { %4549 = vmatprep.mubr.msk.f32.mxu0 %vm222_vm8, %v3907_v25 }
0x2201   :  { %4550 = vmatmul.mubr.msk.f32.vlgmr.msra.gmra.mrb[44].mxu0 %vm222_vm8, %v3908_v26 }
0x22d4   :  { %v4551_v29 = vpop.f32.mrb[44].mxu0 }
0x22d5   :  { %v3998_v30 = vadd.f32 %v4551_v29, %v4137_v22  ;;  %v3992_v31 = vpop.f32.mrb[45].mxu0 }
0x22d6   :  { %v3993_v32 = vadd.f32 %v4137_v22, %v3992_v31 }
0x22d7   :  { %v4002_v28 = vsel %vm137_vm7, %v3998_v30, -inf }
0x22d8   :  { %v4001_v33 = vsel %vm137_vm7, %v3993_v32, -inf }
0x22d9   :  { %v4003_v34 = vmax.f32 %v4001_v33, %v4002_v28 }
0x22db   :  { %v4004_v35 = vsub.f32 %v3993_v32, %v4003_v34  ;;  %v4005_v36 = vsub.f32 %v3998_v30, %v4003_v34 }
0x22dd   :  { %v4006_v37 = vmul.f32 1.442695, %v4004_v35  ;;  %v4008_v38 = vmul.f32 1.442695, %v4005_v36 }
0x22df   :  { %4745 = vpow2.f32 %v4006_v37 }
0x22e0   :  { %4747 = vpow2.f32 %v4008_v38 }
0x22e9   :  { %v4746_v39 = vpop.eup %4745 }
0x22ea   :  { %v4748_v40 = vpop.eup %4747  ;;  %v4010_v41 = vsel %vm137_vm7, %v4746_v39, 0.0 }
0x22eb   :  { %v4011_v42 = vsel %vm137_vm7, %v4748_v40, 0.0 }
0x22ec   :  { %v4012_v43 = vadd.f32 %v4011_v42, %v4010_v41 }
0x22ee   :  { %4749 = vlog2.f32 %v4012_v43 }
0x22f8   :  { %v4750_v44 = vpop.eup %4749 }
0x22f9   :  { %v4014_v47 = vmul.f32 0.6931472, %v4750_v44 }
0x22fb   :  { %v4015_v48 = vsub.f32 %v4004_v35, %v4014_v47  ;;  %v4016_v49 = vsub.f32 %v4005_v36, %v4014_v47 }
0x22fd   :  { %4017 = vst.msk [vmem:[%s5579_s20] sm:$0xff] %vm137_vm7, %v4015_v48  ;;  %4018 = vst.msk [vmem:[%s5579_s20 + $0x8] sm:$0xff] %vm137_vm7, %v4016_v49 }
0x22fe   :  { %4023 = vsyncpa [#allocation3], 1 }

</bundles_post_ra>
